<compile_context>
chip_gen: v6e
topology: v6e:2x2x1
jax: 0.10.0
libtpu: 0.0.40
codegen_flags: <defaults>
</compile_context>

<pallas_src>
import jax
import jax.numpy as jnp
import numpy as np
from jax.experimental import pallas as pl
from jax.experimental.pallas import tpu as pltpu


# Real input width and padded (lane-aligned) layer widths.
IN_F = 784                      # kept unpadded in HBM (== full array extent)
H1_P, H2_P, OUT_P = 384, 128, 128


def mlp_kernel(x_ref, w1_ref, b1_ref, w2_ref, b2_ref, w3_ref, b3_ref, o_ref):
    cdt = w1_ref.dtype                       # MXU input dtype (bf16 by default)
    x = x_ref[...].astype(cdt)               # in-kernel cast (VPU, hidden under MXU)
    # Layer 1: (TM,784) @ (784,384) + (1,384), ReLU   (padded cols stay 0)
    h1 = jnp.dot(x, w1_ref[...], preferred_element_type=jnp.float32)
    h1 = jnp.maximum(h1 + b1_ref[...], 0.0)
    # Layer 2: (TM,384) @ (384,128) + (1,128), ReLU
    h2 = jnp.dot(h1.astype(cdt), w2_ref[...], preferred_element_type=jnp.float32)
    h2 = jnp.maximum(h2 + b2_ref[...], 0.0)
    # Layer 3: (TM,128) @ (128,128) + (1,128)  (no activation)
    h3 = jnp.dot(h2.astype(cdt), w3_ref[...], preferred_element_type=jnp.float32)
    o_ref[...] = (h3 + b3_ref[...]).astype(o_ref.dtype)


def _round_up(n, m):
    return ((n + m - 1) // m) * m


def _cdiv(a, b):
    return -(-a // b)


def _choose_tiling(B, tile_m):
    """Pick (TM, grid_n, B_pad): TM multiple of 8, >=2 (even) tiles when the
    batch allows it (so both v7x TensorCores get work), padded-row waste bounded
    by deriving TM from cdiv(B, grid_n)."""
    B8 = _round_up(B, 8)
    tile_m = max(8, _round_up(tile_m, 8))
    grid_n = max(1, _cdiv(B8, tile_m))
    if grid_n == 1 and B8 >= 16:
        grid_n = 2                      # use both TensorCores on v7x
    if grid_n > 1 and grid_n % 2:
        grid_n += 1                     # even split keeps the two TCs balanced
    TM = _round_up(_cdiv(B8, grid_n), 8)
    grid_n = _cdiv(B8, TM)
    return TM, grid_n, grid_n * TM


def _vmem_limit_bytes(TM, wdtype):
    wbytes = jnp.dtype(wdtype).itemsize
    est = (2 * TM * IN_F * 4                                        # x tiles (f32, x2 buf)
           + 2 * TM * OUT_P * 4                                     # out tiles (x2 buf)
           + 2 * (IN_F * H1_P + H1_P * H2_P + H2_P * OUT_P) * wbytes
           + 2 * (H1_P + H2_P + OUT_P) * 4                          # biases
           + TM * (IN_F * wbytes + H1_P * (4 + wbytes)
                   + H2_P * (4 + wbytes) + OUT_P * 4))              # in-body temps
    # generous headroom, kept below v7x's 64 MiB physical VMEM
    return int(min(56 * 1024 * 1024, max(2 * est, 32 * 1024 * 1024)))


def prepare_params(params, *, compute_dtype=jnp.bfloat16):
    """One-time lane-aligned zero padding + dtype cast of weights/biases.
    Exact: zero rows/cols + ReLU(0)=0 keep padded lanes at exactly zero."""
    w1, b1, w2, b2, w3, b3 = params
    cdt = compute_dtype
    w1p = jnp.zeros((IN_F, H1_P), cdt).at[:, :300].set(w1.astype(cdt))
    b1p = jnp.zeros((1, H1_P), jnp.float32).at[:, :300].set(
        b1.reshape(1, 300).astype(jnp.float32))
    w2p = jnp.zeros((H1_P, H2_P), cdt).at[:300, :100].set(w2.astype(cdt))
    b2p = jnp.zeros((1, H2_P), jnp.float32).at[:, :100].set(
        b2.reshape(1, 100).astype(jnp.float32))
    w3p = jnp.zeros((H2_P, OUT_P), cdt).at[:100, :10].set(w3.astype(cdt))
    b3p = jnp.zeros((1, OUT_P), jnp.float32).at[:, :10].set(
        b3.reshape(1, 10).astype(jnp.float32))
    return (w1p, b1p, w2p, b2p, w3p, b3p)


def simple_deep_rectifier_net(x, padded_params, *, tile_m=1024):
    """x: (B, 1, 28, 28) or (B, 784) float32; padded_params from prepare_params.
    Returns (B, 10) float32 logits."""
    w1p, b1p, w2p, b2p, w3p, b3p = padded_params
    B = x.shape[0]
    x2d = x.reshape(B, -1).astype(jnp.float32)      # x.view(B, -1); f32 in HBM
    assert x2d.shape[1] == IN_F

    TM, grid_n, B_pad = _choose_tiling(B, tile_m)
    if B_pad != B:                                   # batch-only padding (rows sliced off)
        x2d = jnp.pad(x2d, ((0, B_pad - B), (0, 0)))

    flops = 2 * B_pad * (IN_F * H1_P + H1_P * H2_P + H2_P * OUT_P)
    param_bytes = sum(int(np.prod(p.shape)) * p.dtype.itemsize for p in padded_params)
    bytes_accessed = B_pad * IN_F * 4 + B_pad * OUT_P * 4 + param_bytes

    out = pl.pallas_call(
        mlp_kernel,
        out_shape=jax.ShapeDtypeStruct((B_pad, OUT_P), jnp.float32),
        grid=(grid_n,),
        in_specs=[
            # x: streamed one batch tile per grid step (last dim == full extent)
            pl.BlockSpec((TM, IN_F), lambda i: (i, 0)),
            # weights/biases: constant index_map -> DMA'd once, VMEM-resident
            pl.BlockSpec((IN_F, H1_P), lambda i: (0, 0)),
            pl.BlockSpec((1, H1_P), lambda i: (0, 0)),
            pl.BlockSpec((H1_P, H2_P), lambda i: (0, 0)),
            pl.BlockSpec((1, H2_P), lambda i: (0, 0)),
            pl.BlockSpec((H2_P, OUT_P), lambda i: (0, 0)),
            pl.BlockSpec((1, OUT_P), lambda i: (0, 0)),
        ],
        out_specs=pl.BlockSpec((TM, OUT_P), lambda i: (i, 0)),
        compiler_params=pltpu.CompilerParams(
            dimension_semantics=("parallel",),           # batch tiles across TCs (v7x)
            vmem_limit_bytes=_vmem_limit_bytes(TM, w1p.dtype),
        ),
        cost_estimate=pl.CostEstimate(
            flops=flops, transcendentals=0, bytes_accessed=bytes_accessed),
    )(x2d, w1p, b1p, w2p, b2p, w3p, b3p)

    return out[:B, :10]


def xavier_uniform(key, fan_in, fan_out):
    # matches torch.nn.init.xavier_uniform_ semantics (gain=1)
    limit = float(np.sqrt(6.0 / (fan_in + fan_out)))
    # stored as (in, out) = transpose of the PyTorch (out, in) weight
    return jax.random.uniform(key, (fan_in, fan_out), jnp.float32, -limit, limit)


def init_params(key):
    k1, k2, k3 = jax.random.split(key, 3)
    w1 = xavier_uniform(k1, 784, 300)
    w2 = xavier_uniform(k2, 300, 100)
    w3 = xavier_uniform(k3, 100, 10)
    b1 = jnp.zeros((1, 300), jnp.float32)
    b2 = jnp.zeros((1, 100), jnp.float32)
    b3 = jnp.zeros((1, 10), jnp.float32)
    return (w1, b1, w2, b2, w3, b3)


def reference_forward(x, params):
    w1, b1, w2, b2, w3, b3 = params
    x2d = x.reshape(x.shape[0], -1)
    h1 = jnp.maximum(x2d @ w1 + b1, 0.0)
    h2 = jnp.maximum(h1 @ w2 + b2, 0.0)
    return h2 @ w3 + b3


if __name__ == "__main__":
    key = jax.random.PRNGKey(0)
    kx, kp = jax.random.split(key)
    # MNIST-like NCHW input; forward flattens it to (B, 784)
    x = jax.random.normal(kx, (8, 1, 28, 28), jnp.float32)
    params = init_params(kp)
    ref = reference_forward(x, params)

    # f32 path: exact vs. pure-JAX reference
    params_f32 = prepare_params(params, compute_dtype=jnp.float32)
    out_f32 = jax.block_until_ready(simple_deep_rectifier_net(x, params_f32))
    np.testing.assert_allclose(np.asarray(out_f32), np.asarray(ref),
                               rtol=1e-5, atol=1e-5)

    # default bf16 MXU path (f32 accumulation): relaxed tolerance
    params_bf16 = prepare_params(params)
    out_bf16 = jax.block_until_ready(simple_deep_rectifier_net(x, params_bf16))
    np.testing.assert_allclose(np.asarray(out_bf16), np.asarray(ref),
                               rtol=5e-2, atol=1e-1)

    assert out_f32.shape == (8, 10) and out_bf16.shape == (8, 10)
    print("KERNEL_OK")
</pallas_src>

<mosaic_0001>
module attributes {stable_mosaic.version = 11 : i64} {
  func.func @mlp_kernel(%arg0: i32, %arg1: memref<8x784xf32, #tpu.memory_space<vmem>>, %arg2: memref<784x384xf32, #tpu.memory_space<vmem>>, %arg3: memref<1x384xf32, #tpu.memory_space<vmem>>, %arg4: memref<384x128xf32, #tpu.memory_space<vmem>>, %arg5: memref<1x128xf32, #tpu.memory_space<vmem>>, %arg6: memref<128x128xf32, #tpu.memory_space<vmem>>, %arg7: memref<1x128xf32, #tpu.memory_space<vmem>>, %arg8: memref<8x128xf32, #tpu.memory_space<vmem>>) attributes {dimension_semantics = [#tpu.dimension_semantics<parallel>], iteration_bounds = array<i64: 1>, scalar_prefetch = 0 : i64, scratch_operands = 0 : i64, tpu.core_type = #tpu.core_type<tc>, window_params = [{transform_indices = @transform_0, window_bounds = array<i64: 8, 784>}, {pipeline_mode = #tpu.pipeline_mode<synchronous>, transform_indices = @transform_1, window_bounds = array<i64: 784, 384>}, {pipeline_mode = #tpu.pipeline_mode<synchronous>, transform_indices = @transform_2, window_bounds = array<i64: 1, 384>}, {pipeline_mode = #tpu.pipeline_mode<synchronous>, transform_indices = @transform_3, window_bounds = array<i64: 384, 128>}, {pipeline_mode = #tpu.pipeline_mode<synchronous>, transform_indices = @transform_4, window_bounds = array<i64: 1, 128>}, {pipeline_mode = #tpu.pipeline_mode<synchronous>, transform_indices = @transform_5, window_bounds = array<i64: 128, 128>}, {pipeline_mode = #tpu.pipeline_mode<synchronous>, transform_indices = @transform_6, window_bounds = array<i64: 1, 128>}, {transform_indices = @transform_7, window_bounds = array<i64: 8, 128>}]} {
    %c0 = arith.constant 0 : index
    %c0_0 = arith.constant 0 : index
    %0 = vector.load %arg1[%c0, %c0_0] : memref<8x784xf32, #tpu.memory_space<vmem>>, vector<8x784xf32>
    %c0_1 = arith.constant 0 : index
    %c0_2 = arith.constant 0 : index
    %1 = vector.load %arg2[%c0_1, %c0_2] : memref<784x384xf32, #tpu.memory_space<vmem>>, vector<784x384xf32>
    %cst = arith.constant dense<0.000000e+00> : vector<8x384xf32>
    %2 = tpu.matmul %0, %1, %cst {dimension_numbers = #tpu.dot_dimension_numbers<[1], [0], [0], [1], [0, 0, 1, 1], [], []>} : vector<8x784xf32>, vector<784x384xf32>, vector<8x384xf32> -> vector<8x384xf32>
    %c0_3 = arith.constant 0 : index
    %c0_4 = arith.constant 0 : index
    %3 = vector.load %arg3[%c0_3, %c0_4] : memref<1x384xf32, #tpu.memory_space<vmem>>, vector<1x384xf32>
    %4 = vector.broadcast %3 : vector<1x384xf32> to vector<8x384xf32>
    %5 = arith.addf %2, %4 : vector<8x384xf32>
    %cst_5 = arith.constant 0.000000e+00 : f32
    %6 = vector.broadcast %cst_5 : f32 to vector<8x384xf32>
    %7 = arith.maximumf %5, %6 : vector<8x384xf32>
    %c0_6 = arith.constant 0 : index
    %c0_7 = arith.constant 0 : index
    %8 = vector.load %arg4[%c0_6, %c0_7] : memref<384x128xf32, #tpu.memory_space<vmem>>, vector<384x128xf32>
    %cst_8 = arith.constant dense<0.000000e+00> : vector<8x128xf32>
    %9 = tpu.matmul %7, %8, %cst_8 {dimension_numbers = #tpu.dot_dimension_numbers<[1], [0], [0], [1], [0, 0, 1, 1], [], []>} : vector<8x384xf32>, vector<384x128xf32>, vector<8x128xf32> -> vector<8x128xf32>
    %c0_9 = arith.constant 0 : index
    %c0_10 = arith.constant 0 : index
    %10 = vector.load %arg5[%c0_9, %c0_10] : memref<1x128xf32, #tpu.memory_space<vmem>>, vector<1x128xf32>
    %11 = vector.broadcast %10 : vector<1x128xf32> to vector<8x128xf32>
    %12 = arith.addf %9, %11 : vector<8x128xf32>
    %cst_11 = arith.constant 0.000000e+00 : f32
    %13 = vector.broadcast %cst_11 : f32 to vector<8x128xf32>
    %14 = arith.maximumf %12, %13 : vector<8x128xf32>
    %c0_12 = arith.constant 0 : index
    %c0_13 = arith.constant 0 : index
    %15 = vector.load %arg6[%c0_12, %c0_13] : memref<128x128xf32, #tpu.memory_space<vmem>>, vector<128x128xf32>
    %cst_14 = arith.constant dense<0.000000e+00> : vector<8x128xf32>
    %16 = tpu.matmul %14, %15, %cst_14 {dimension_numbers = #tpu.dot_dimension_numbers<[1], [0], [0], [1], [0, 0, 1, 1], [], []>} : vector<8x128xf32>, vector<128x128xf32>, vector<8x128xf32> -> vector<8x128xf32>
    %c0_15 = arith.constant 0 : index
    %c0_16 = arith.constant 0 : index
    %17 = vector.load %arg7[%c0_15, %c0_16] : memref<1x128xf32, #tpu.memory_space<vmem>>, vector<1x128xf32>
    %18 = vector.broadcast %17 : vector<1x128xf32> to vector<8x128xf32>
    %19 = arith.addf %16, %18 : vector<8x128xf32>
    %c0_17 = arith.constant 0 : index
    %c0_18 = arith.constant 0 : index
    %20 = vector.load %arg8[%c0_17, %c0_18] : memref<8x128xf32, #tpu.memory_space<vmem>>, vector<8x128xf32>
    tpu.vector_store %arg8[%c0_17, %c0_18], %19 {strides = array<i32>} : memref<8x128xf32, #tpu.memory_space<vmem>>, vector<8x128xf32>,
    return
  }
  func.func @transform_0(%arg0: i32) -> (i32, i32) {
    %c0_i32 = arith.constant 0 : i32
    %c0_i32_0 = arith.constant 0 : i32
    return %arg0, %c0_i32 : i32, i32
  }
  func.func @transform_1(%arg0: i32) -> (i32, i32) {
    %c0_i32 = arith.constant 0 : i32
    %c0_i32_0 = arith.constant 0 : i32
    %c0_i32_1 = arith.constant 0 : i32
    return %c0_i32, %c0_i32_0 : i32, i32
  }
  func.func @transform_2(%arg0: i32) -> (i32, i32) {
    %c0_i32 = arith.constant 0 : i32
    %c0_i32_0 = arith.constant 0 : i32
    %c0_i32_1 = arith.constant 0 : i32
    return %c0_i32, %c0_i32_0 : i32, i32
  }
  func.func @transform_3(%arg0: i32) -> (i32, i32) {
    %c0_i32 = arith.constant 0 : i32
    %c0_i32_0 = arith.constant 0 : i32
    %c0_i32_1 = arith.constant 0 : i32
    return %c0_i32, %c0_i32_0 : i32, i32
  }
  func.func @transform_4(%arg0: i32) -> (i32, i32) {
    %c0_i32 = arith.constant 0 : i32
    %c0_i32_0 = arith.constant 0 : i32
    %c0_i32_1 = arith.constant 0 : i32
    return %c0_i32, %c0_i32_0 : i32, i32
  }
  func.func @transform_5(%arg0: i32) -> (i32, i32) {
    %c0_i32 = arith.constant 0 : i32
    %c0_i32_0 = arith.constant 0 : i32
    %c0_i32_1 = arith.constant 0 : i32
    return %c0_i32, %c0_i32_0 : i32, i32
  }
  func.func @transform_6(%arg0: i32) -> (i32, i32) {
    %c0_i32 = arith.constant 0 : i32
    %c0_i32_0 = arith.constant 0 : i32
    %c0_i32_1 = arith.constant 0 : i32
    return %c0_i32, %c0_i32_0 : i32, i32
  }
  func.func @transform_7(%arg0: i32) -> (i32, i32) {
    %c0_i32 = arith.constant 0 : i32
    %c0_i32_0 = arith.constant 0 : i32
    return %arg0, %c0_i32 : i32, i32
  }
}

</mosaic_0001>

<bundles_post_ra>
// kernel: tpu_custom_call.1
= control target key start
LH: loop header
LB: loop body
LE: loop exit
PB: predicated region body
PF: predicated region fallthrough
CT: control target
= control target key end

     0   :  { %12 = vsyncpa [#allocation3], 0  ;;  %s1894_s0 = inlined_call_operand.hbm [shape: f32[8,784], index: 0, kind: input, shape index: {}]   ;;  %s1895_s1 = inlined_call_operand.hbm [shape: f32[784,384], index: 1, kind: input, shape index: {}]   ;;  %s1896_s2 = inlined_call_operand.hbm [shape: f32[1,384], index: 2, kind: input, shape index: {}]   ;;  %s1897_s3 = inlined_call_operand.hbm [shape: f32[384,128], index: 3, kind: input, shape index: {}]   ;;  %s1898_s4 = inlined_call_operand.hbm [shape: f32[1,128], index: 4, kind: input, shape index: {}]   ;;  %s1899_s5 = inlined_call_operand.hbm [shape: f32[128,128], index: 5, kind: input, shape index: {}]   ;;  %s1900_s6 = inlined_call_operand.hbm [shape: f32[1,128], index: 6, kind: input, shape index: {}]   ;;  %s1901_s7 = inlined_call_operand.hbm [shape: f32[8,128], index: 7, kind: output, shape index: {}]  }
   0x1   :  { %13 = vsyncpa [#allocation6], 0 }
   0x2   :  { %14 = vsyncpa [#allocation9], 0 }
   0x3   :  { %15 = vsyncpa [#allocation12], 0 }
   0x4   :  { %16 = vsyncpa [#allocation4], 0  ;;  %s1753_s24 = smov [#allocation5]  }
   0x5   :  { %s32_s25 = sshll.u32 %s1753_s24, 4  ;;  %s33_s25 = int_to_ptr.vmem [resolvable:$true] %s32_s25 }
   0x6   :  { %s1591_s26 = scalar_lea.vmem %s33_s25, 37632  ;;  %p1596_p1 = scmp.lt.s32.totalorder %s33_s25, %s33_s25 }
   0x7   :  { %p1592_p0 = scmp.ne.s32.totalorder %s33_s25, %s1591_s26  ;;  %p1597_p2 = scmp.lt.s32.totalorder %s1591_s26, %s1591_s26 }
   0x9   :  { %p1598_p3 = por %p1597_p2, %p1596_p1 }
   0xb   :  { %p1599_p4 = pnand %p1598_p3, %p1592_p0 }
   0xd   :  { %1602 = shalt.err (!%p1599_p4)
}
   0xe   :  { %s1754_s27 = smov 384   ;;  %s1755_s28 = smov 24  }
   0xf   :  { %38 = dma.hbm_to_vmem [thread:$0]  %s1895_s1, 37632, %s33_s25, [#allocation6], %s1754_s27, %s1754_s27, %s1755_s28  }
  0x10   :  { %s1756_s8 = smov [#allocation8]  }
  0x11   :  { %s54_s9 = sshll.u32 %s1756_s8, 4  ;;  %s55_s9 = int_to_ptr.vmem [resolvable:$true] %s54_s9 }
  0x12   :  { %s1611_s10 = scalar_lea.vmem %s55_s9, 6144  ;;  %p1616_p6 = scmp.lt.s32.totalorder %s55_s9, %s55_s9 }
  0x13   :  { %p1612_p5 = scmp.ne.s32.totalorder %s55_s9, %s1611_s10  ;;  %p1617_p7 = scmp.lt.s32.totalorder %s1611_s10, %s1611_s10 }
  0x15   :  { %p1618_p8 = por %p1617_p7, %p1616_p6 }
  0x17   :  { %p1619_p9 = pnand %p1618_p8, %p1612_p5 }
  0x19   :  { %1622 = shalt.err (!%p1619_p9)
}
  0x1a   :  { %s1757_s11 = smov 128   ;;  %s1758_s12 = smov 8  }
  0x1b   :  { %60 = dma.hbm_to_vmem [thread:$0]  %s1897_s3, 6144, %s55_s9, [#allocation9], %s1757_s11, %s1757_s11, %s1758_s12  }
  0x1c   :  { %s1759_s15 = smov [#allocation11]   ;;  %s1760_s17 = smov [#allocation2]  }
  0x1d   :  { %s76_s16 = sshll.u32 %s1759_s15, 4  ;;  %s23_s1 = sshll.u32 %s1760_s17, 4  ;;  %s77_s16 = int_to_ptr.vmem [resolvable:$true] %s76_s16  ;;  %s24_s1 = int_to_ptr.vmem [resolvable:$true] %s23_s1 }
  0x1e   :  { %s1631_s18 = scalar_lea.vmem %s77_s16, 2048  ;;  %p1636_p11 = scmp.lt.s32.totalorder %s77_s16, %s77_s16 }
  0x1f   :  { %p1632_p10 = scmp.ne.s32.totalorder %s77_s16, %s1631_s18  ;;  %p1637_p12 = scmp.lt.s32.totalorder %s1631_s18, %s1631_s18 }
  0x21   :  { %p1638_p13 = por %p1637_p12, %p1636_p11 }
  0x23   :  { %p1639_p0 = pnand %p1638_p13, %p1632_p10 }
  0x25   :  { %1642 = shalt.err (!%p1639_p0)
}
  0x26   :  { %82 = dma.hbm_to_vmem [thread:$0]  %s1899_s5, 2048, %s77_s16, [#allocation12], %s1757_s11, %s1757_s11, %s1758_s12  }
  0x27   :  { %s1651_s21 = scalar_lea.vmem %s24_s1, 896  ;;  %p1656_p2 = scmp.lt.s32.totalorder %s24_s1, %s24_s1 }
  0x28   :  { %p1652_p1 = scmp.ne.s32.totalorder %s24_s1, %s1651_s21  ;;  %p1657_p3 = scmp.lt.s32.totalorder %s1651_s21, %s1651_s21 }
  0x2a   :  { %p1658_p4 = por %p1657_p3, %p1656_p2 }
  0x2c   :  { %p1659_p5 = pnand %p1658_p4, %p1652_p1 }
  0x2e   :  { %1662 = shalt.err (!%p1659_p5)
}
  0x2f   :  { %26 = dma.hbm_to_vmem [thread:$0]  %s1894_s0, 896, %s24_s1, [#allocation3]  }
  0x30   :  { %s1761_s23 = smov [#allocation7]   ;;  %s1762_s25 = smov [#allocation10]  }
  0x31   :  { %s45_s24 = sshll.u32 %s1761_s23, 4  ;;  %s67_s26 = sshll.u32 %s1762_s25, 4  ;;  %s46_s24 = int_to_ptr.vmem [resolvable:$true] %s45_s24  ;;  %s68_s26 = int_to_ptr.vmem [resolvable:$true] %s67_s26 }
  0x32   :  { %s1671_s27 = scalar_lea.vmem %s46_s24, 48  ;;  %s1675_s5 = scalar_lea.vmem %s46_s24, 64 }
  0x33   :  { %p1672_p6 = scmp.ne.s32.totalorder %s46_s24, %s1671_s27  ;;  %p1676_p7 = scmp.lt.s32.totalorder %s46_s24, %s46_s24 }
  0x34   :  { %p1677_p8 = scmp.lt.s32.totalorder %s1675_s5, %s1671_s27 }
  0x36   :  { %p1678_p9 = por %p1677_p8, %p1676_p7 }
  0x38   :  { %p1679_p10 = pnand %p1678_p9, %p1672_p6 }
  0x3a   :  { %1682 = shalt.err (!%p1679_p10)
}
  0x3b   :  { %48 = dma.hbm_to_vmem [thread:$0]  %s1896_s2, 48, %s46_s24, [#allocation6]  }
  0x3c   :  { %s1691_s30 = scalar_lea.vmem %s68_s26, 16  ;;  %s1695_s0 = scalar_lea.vmem %s68_s26, 32 }
  0x3d   :  { %p1692_p11 = scmp.ne.s32.totalorder %s68_s26, %s1691_s30  ;;  %p1696_p12 = scmp.lt.s32.totalorder %s68_s26, %s68_s26 }
  0x3e   :  { %p1697_p13 = scmp.lt.s32.totalorder %s1695_s0, %s1691_s30 }
  0x40   :  { %p1698_p0 = por %p1697_p13, %p1696_p12 }
  0x42   :  { %p1699_p1 = pnand %p1698_p0, %p1692_p11 }
  0x44   :  { %1702 = shalt.err (!%p1699_p1)
}
  0x45   :  { %70 = dma.hbm_to_vmem [thread:$0]  %s1898_s4, 16, %s68_s26, [#allocation9]  }
  0x46   :  { %s1763_s10 = smov [#allocation13]  }
  0x47   :  { %s89_s11 = sshll.u32 %s1763_s10, 4  ;;  %s90_s11 = int_to_ptr.vmem [resolvable:$true] %s89_s11 }
  0x48   :  { %s1711_s12 = scalar_lea.vmem %s90_s11, 16  ;;  %s1715_s13 = scalar_lea.vmem %s90_s11, 32 }
  0x49   :  { %p1712_p2 = scmp.ne.s32.totalorder %s90_s11, %s1711_s12  ;;  %p1716_p3 = scmp.lt.s32.totalorder %s90_s11, %s90_s11 }
  0x4a   :  { %p1717_p4 = scmp.lt.s32.totalorder %s1715_s13, %s1711_s12 }
  0x4c   :  { %p1718_p5 = por %p1717_p4, %p1716_p3 }
  0x4e   :  { %p1719_p6 = pnand %p1718_p5, %p1712_p2 }
  0x50   :  { %1722 = shalt.err (!%p1719_p6)
}
  0x51   :  { %92 = dma.hbm_to_vmem [thread:$0]  %s1900_s6, 16, %s90_s11, [#allocation12]  }
  0x52   :  { %1743 = dma.done.wait [#allocation3], 896  }
  0x53   :  { %1744 = vsyncadd [#allocation3], 4294966400 }
  0x54   :  { %1745 = dma.done.wait [#allocation6], 37680  }
  0x55   :  { %1746 = vsyncadd [#allocation6], 4294929616 }
  0x56   :  { %1747 = dma.done.wait [#allocation9], 6160  }
  0x57   :  { %1748 = vsyncadd [#allocation9], 4294961136 }
  0x58   :  { %1749 = dma.done.wait [#allocation12], 2064  }
  0x59   :  { %1750 = vsyncadd [#allocation12], 4294965232  ;;  %v167_v0 = vld [vmem:[#allocation5 + $0x170] sm:$0xff]  ;;  %v166_v1 = vld [vmem:[#allocation5 + $0x168] sm:$0xff]  ;;  %vm432_vm0 = vcmask 130048   ;;  %vm1765_vm1 = vmmov 0  }
  0x5a   :  { %v164_v2 = vld [vmem:[#allocation5 + $0x158] sm:$0xff]  ;;  %436 = vmatprep.subr.mxu0 %v167_v0  ;;  %v263_v3 = vld [vmem:[#allocation5 + $0x470] sm:$0xff]  ;;  %v262_v5 = vld [vmem:[#allocation5 + $0x468] sm:$0xff]  ;;  %s1766_s4 = smov [#allocation14]  }
  0x5b   :  { %v163_v4 = vld [vmem:[#allocation5 + $0x150] sm:$0xff]  ;;  %437 = vmatpush1.msra.mxu0 %v166_v1  ;;  %507 = vmatprep.subr.mxu1 %v263_v3  ;;  %v161_v6 = vld [vmem:[#allocation5 + $0x140] sm:$0xff]  ;;  %v260_v7 = vld [vmem:[#allocation5 + $0x458] sm:$0xff]  ;;  %s1299_s6 = sshll.u32 %s1766_s4, 4  ;;  %s1300_s6 = int_to_ptr.vmem [resolvable:$true] %s1299_s6 }
  0x5c   :  { %438 = vmatprep.subr.mxu0 %v164_v2  ;;  %508 = vmatpush1.msra.mxu1 %v262_v5  ;;  %v160_v8 = vld [vmem:[#allocation5 + $0x138] sm:$0xff]  ;;  %v259_v9 = vld [vmem:[#allocation5 + $0x450] sm:$0xff]  ;;  %v257_v10 = vld [vmem:[#allocation5 + $0x440] sm:$0xff]  ;;  %s1723_s15 = scalar_lea.vmem %s1300_s6, 128  ;;  %p1728_p8 = scmp.lt.s32.totalorder %s1300_s6, %s1300_s6 }
  0x5d   :  { %439 = vmatpush1.msra.mxu0 %v163_v4  ;;  %509 = vmatprep.subr.mxu1 %v260_v7  ;;  %v158_v11 = vld [vmem:[#allocation5 + $0x128] sm:$0xff]  ;;  %v256_v12 = vld [vmem:[#allocation5 + $0x438] sm:$0xff]  ;;  %v157_v13 = vld [vmem:[#allocation5 + $0x120] sm:$0xff]  ;;  %p1724_p7 = scmp.ne.s32.totalorder %s1300_s6, %s1723_s15  ;;  %p1729_p9 = scmp.lt.s32.totalorder %s1723_s15, %s1723_s15 }
  0x5e   :  { %440 = vmatprep.subr.mxu0 %v161_v6  ;;  %510 = vmatpush1.msra.mxu1 %v259_v9  ;;  %v254_v14 = vld [vmem:[#allocation5 + $0x428] sm:$0xff]  ;;  %v155_v15 = vld [vmem:[#allocation5 + $0x110] sm:$0xff]  ;;  %v253_v16 = vld [vmem:[#allocation5 + $0x420] sm:$0xff] }
  0x5f   :  { %441 = vmatpush1.msra.mxu0 %v160_v8  ;;  %511 = vmatprep.subr.mxu1 %v257_v10  ;;  %v154_v17 = vld [vmem:[#allocation5 + $0x108] sm:$0xff]  ;;  %v251_v18 = vld [vmem:[#allocation5 + $0x410] sm:$0xff]  ;;  %v152_v19 = vld [vmem:[#allocation5 + $0xf8] sm:$0xff]  ;;  %p1730_p10 = por %p1729_p9, %p1728_p8 }
  0x60   :  { %442 = vmatprep.subr.mxu0 %v158_v11  ;;  %512 = vmatpush1.msra.mxu1 %v256_v12  ;;  %v250_v20 = vld [vmem:[#allocation5 + $0x408] sm:$0xff]  ;;  %v151_v21 = vld [vmem:[#allocation5 + $0xf0] sm:$0xff]  ;;  %v248_v22 = vld [vmem:[#allocation5 + $0x3f8] sm:$0xff] }
  0x61   :  { %443 = vmatpush1.msra.mxu0 %v157_v13  ;;  %513 = vmatprep.subr.mxu1 %v254_v14  ;;  %v149_v23 = vld [vmem:[#allocation5 + $0xe0] sm:$0xff]  ;;  %v247_v24 = vld [vmem:[#allocation5 + $0x3f0] sm:$0xff]  ;;  %v148_v25 = vld [vmem:[#allocation5 + $0xd8] sm:$0xff]  ;;  %p1731_p11 = pnand %p1730_p10, %p1724_p7 }
  0x62   :  { %444 = vmatprep.subr.mxu0 %v155_v15  ;;  %514 = vmatpush1.msra.mxu1 %v253_v16  ;;  %v245_v26 = vld [vmem:[#allocation5 + $0x3e0] sm:$0xff]  ;;  %v146_v27 = vld [vmem:[#allocation5 + $0xc8] sm:$0xff]  ;;  %v244_v28 = vld [vmem:[#allocation5 + $0x3d8] sm:$0xff] }
  0x63   :  { %445 = vmatpush1.msra.mxu0 %v154_v17  ;;  %515 = vmatprep.subr.mxu1 %v251_v18  ;;  %v145_v29 = vld [vmem:[#allocation5 + $0xc0] sm:$0xff]  ;;  %v242_v30 = vld [vmem:[#allocation5 + $0x3c8] sm:$0xff]  ;;  %v143_v31 = vld [vmem:[#allocation5 + $0xb0] sm:$0xff] }
  0x64   :  { %446 = vmatprep.subr.mxu0 %v152_v19  ;;  %516 = vmatpush1.msra.mxu1 %v250_v20  ;;  %v241_v32 = vld [vmem:[#allocation5 + $0x3c0] sm:$0xff]  ;;  %v142_v33 = vld [vmem:[#allocation5 + $0xa8] sm:$0xff]  ;;  %v239_v34 = vld [vmem:[#allocation5 + $0x3b0] sm:$0xff] }
  0x65   :  { %447 = vmatpush1.msra.mxu0 %v151_v21  ;;  %517 = vmatprep.subr.mxu1 %v248_v22  ;;  %v140_v35 = vld [vmem:[#allocation5 + $0x98] sm:$0xff]  ;;  %v238_v36 = vld [vmem:[#allocation5 + $0x3a8] sm:$0xff]  ;;  %v139_v37 = vld [vmem:[#allocation5 + $0x90] sm:$0xff] }
  0x66   :  { %448 = vmatprep.subr.mxu0 %v149_v23  ;;  %518 = vmatpush1.msra.mxu1 %v247_v24  ;;  %v236_v38 = vld [vmem:[#allocation5 + $0x398] sm:$0xff]  ;;  %v137_v39 = vld [vmem:[#allocation5 + $0x80] sm:$0xff]  ;;  %v235_v40 = vld [vmem:[#allocation5 + $0x390] sm:$0xff] }
  0x67   :  { %449 = vmatpush1.msra.mxu0 %v148_v25  ;;  %519 = vmatprep.subr.mxu1 %v245_v26  ;;  %v136_v41 = vld [vmem:[#allocation5 + $0x78] sm:$0xff]  ;;  %v233_v42 = vld [vmem:[#allocation5 + $0x380] sm:$0xff]  ;;  %v134_v43 = vld [vmem:[#allocation5 + $0x68] sm:$0xff] }
  0x68   :  { %450 = vmatprep.subr.mxu0 %v146_v27  ;;  %520 = vmatpush1.msra.mxu1 %v244_v28  ;;  %v232_v44 = vld [vmem:[#allocation5 + $0x378] sm:$0xff]  ;;  %v133_v45 = vld [vmem:[#allocation5 + $0x60] sm:$0xff]  ;;  %v230_v46 = vld [vmem:[#allocation5 + $0x368] sm:$0xff] }
  0x69   :  { %451 = vmatpush1.msra.mxu0 %v145_v29  ;;  %521 = vmatprep.subr.mxu1 %v242_v30  ;;  %v131_v47 = vld [vmem:[#allocation5 + $0x50] sm:$0xff]  ;;  %v229_v48 = vld [vmem:[#allocation5 + $0x360] sm:$0xff]  ;;  %v130_v49 = vld [vmem:[#allocation5 + $0x48] sm:$0xff] }
  0x6a   :  { %452 = vmatprep.subr.mxu0 %v143_v31  ;;  %522 = vmatpush1.msra.mxu1 %v241_v32  ;;  %v227_v50 = vld [vmem:[#allocation5 + $0x350] sm:$0xff]  ;;  %v128_v51 = vld [vmem:[#allocation5 + $0x38] sm:$0xff]  ;;  %v226_v52 = vld [vmem:[#allocation5 + $0x348] sm:$0xff] }
  0x6b   :  { %453 = vmatpush1.msra.mxu0 %v142_v33  ;;  %523 = vmatprep.subr.mxu1 %v239_v34  ;;  %v127_v53 = vld [vmem:[#allocation5 + $0x30] sm:$0xff]  ;;  %v224_v54 = vld [vmem:[#allocation5 + $0x338] sm:$0xff]  ;;  %v125_v55 = vld [vmem:[#allocation5 + $0x20] sm:$0xff] }
  0x6c   :  { %454 = vmatprep.subr.mxu0 %v140_v35  ;;  %524 = vmatpush1.msra.mxu1 %v238_v36  ;;  %v223_v56 = vld [vmem:[#allocation5 + $0x330] sm:$0xff]  ;;  %v124_v57 = vld [vmem:[#allocation5 + $0x18] sm:$0xff]  ;;  %v221_v58 = vld [vmem:[#allocation5 + $0x320] sm:$0xff] }
  0x6d   :  { %455 = vmatpush1.msra.mxu0 %v139_v37  ;;  %525 = vmatprep.subr.mxu1 %v236_v38  ;;  %v122_v59 = vld [vmem:[#allocation5 + $0x8] sm:$0xff]  ;;  %v220_v60 = vld [vmem:[#allocation5 + $0x318] sm:$0xff]  ;;  %v121_v61 = vld [vmem:[#allocation5] sm:$0xff] }
  0x6e   :  { %456 = vmatprep.subr.mxu0 %v137_v39  ;;  %526 = vmatpush1.msra.mxu1 %v235_v40  ;;  %v218_v62 = vld [vmem:[#allocation5 + $0x308] sm:$0xff]  ;;  %v215_v63 = vld [vmem:[#allocation5 + $0x2f0] sm:$0xff]  ;;  %v217_v0 = vld [vmem:[#allocation5 + $0x300] sm:$0xff] }
  0x6f   :  { %457 = vmatpush1.msra.mxu0 %v136_v41  ;;  %527 = vmatprep.subr.mxu1 %v233_v42  ;;  %v214_v1 = vld [vmem:[#allocation5 + $0x2e8] sm:$0xff]  ;;  %v311_v2 = vld [vmem:[#allocation5 + $0x5f0] sm:$0xff]  ;;  %v212_v3 = vld [vmem:[#allocation5 + $0x2d8] sm:$0xff] }
  0x70   :  { %458 = vmatprep.subr.mxu0 %v134_v43  ;;  %528 = vmatpush1.msra.mxu1 %v232_v44  ;;  %v310_v4 = vld [vmem:[#allocation5 + $0x5e8] sm:$0xff]  ;;  %v211_v5 = vld [vmem:[#allocation5 + $0x2d0] sm:$0xff]  ;;  %v308_v6 = vld [vmem:[#allocation5 + $0x5d8] sm:$0xff] }
  0x71   :  { %459 = vmatpush1.msra.mxu0 %v133_v45  ;;  %529 = vmatprep.subr.mxu1 %v230_v46  ;;  %v209_v7 = vld [vmem:[#allocation5 + $0x2c0] sm:$0xff]  ;;  %v307_v8 = vld [vmem:[#allocation5 + $0x5d0] sm:$0xff]  ;;  %v208_v9 = vld [vmem:[#allocation5 + $0x2b8] sm:$0xff] }
  0x72   :  { %460 = vmatprep.subr.mxu0 %v131_v47  ;;  %530 = vmatpush1.msra.mxu1 %v229_v48  ;;  %v305_v10 = vld [vmem:[#allocation5 + $0x5c0] sm:$0xff]  ;;  %v206_v11 = vld [vmem:[#allocation5 + $0x2a8] sm:$0xff]  ;;  %v304_v12 = vld [vmem:[#allocation5 + $0x5b8] sm:$0xff] }
  0x73   :  { %461 = vmatpush1.msra.mxu0 %v130_v49  ;;  %531 = vmatprep.subr.mxu1 %v227_v50  ;;  %v205_v13 = vld [vmem:[#allocation5 + $0x2a0] sm:$0xff]  ;;  %v302_v14 = vld [vmem:[#allocation5 + $0x5a8] sm:$0xff]  ;;  %v203_v15 = vld [vmem:[#allocation5 + $0x290] sm:$0xff] }
  0x74   :  { %462 = vmatprep.subr.mxu0 %v128_v51  ;;  %532 = vmatpush1.msra.mxu1 %v226_v52  ;;  %v301_v16 = vld [vmem:[#allocation5 + $0x5a0] sm:$0xff]  ;;  %v202_v17 = vld [vmem:[#allocation5 + $0x288] sm:$0xff]  ;;  %v299_v18 = vld [vmem:[#allocation5 + $0x590] sm:$0xff] }
  0x75   :  { %463 = vmatpush1.msra.mxu0 %v127_v53  ;;  %533 = vmatprep.subr.mxu1 %v224_v54  ;;  %v200_v19 = vld [vmem:[#allocation5 + $0x278] sm:$0xff]  ;;  %v298_v20 = vld [vmem:[#allocation5 + $0x588] sm:$0xff]  ;;  %v199_v21 = vld [vmem:[#allocation5 + $0x270] sm:$0xff] }
  0x76   :  { %464 = vmatprep.subr.mxu0 %v125_v55  ;;  %534 = vmatpush1.msra.mxu1 %v223_v56  ;;  %v296_v22 = vld [vmem:[#allocation5 + $0x578] sm:$0xff]  ;;  %v197_v23 = vld [vmem:[#allocation5 + $0x260] sm:$0xff]  ;;  %v295_v24 = vld [vmem:[#allocation5 + $0x570] sm:$0xff] }
  0x77   :  { %465 = vmatpush1.msra.mxu0 %v124_v57  ;;  %535 = vmatprep.subr.mxu1 %v221_v58  ;;  %v196_v25 = vld [vmem:[#allocation5 + $0x258] sm:$0xff]  ;;  %v293_v26 = vld [vmem:[#allocation5 + $0x560] sm:$0xff]  ;;  %v194_v27 = vld [vmem:[#allocation5 + $0x248] sm:$0xff] }
  0x78   :  { %466 = vmatprep.subr.mxu0 %v122_v59  ;;  %536 = vmatpush1.msra.mxu1 %v220_v60  ;;  %v292_v28 = vld [vmem:[#allocation5 + $0x558] sm:$0xff]  ;;  %v193_v29 = vld [vmem:[#allocation5 + $0x240] sm:$0xff]  ;;  %v290_v30 = vld [vmem:[#allocation5 + $0x548] sm:$0xff] }
  0x79   :  { %467 = vmatpush1.msra.mxu0 %v121_v61  ;;  %537 = vmatprep.subr.mxu1 %v218_v62  ;;  %v191_v31 = vld [vmem:[#allocation5 + $0x230] sm:$0xff]  ;;  %v289_v32 = vld [vmem:[#allocation5 + $0x540] sm:$0xff]  ;;  %v190_v33 = vld [vmem:[#allocation5 + $0x228] sm:$0xff] }
  0x7a   :  { %468 = vmatprep.subr.mxu0 %v215_v63  ;;  %538 = vmatpush1.msra.mxu1 %v217_v0  ;;  %v287_v34 = vld [vmem:[#allocation5 + $0x530] sm:$0xff]  ;;  %v188_v35 = vld [vmem:[#allocation5 + $0x218] sm:$0xff]  ;;  %v286_v36 = vld [vmem:[#allocation5 + $0x528] sm:$0xff] }
  0x7b   :  { %469 = vmatpush2.msra.mxu0 %v214_v1  ;;  %539 = vmatprep.subr.mxu1 %v311_v2  ;;  %v187_v37 = vld [vmem:[#allocation5 + $0x210] sm:$0xff]  ;;  %v284_v38 = vld [vmem:[#allocation5 + $0x518] sm:$0xff]  ;;  %v185_v39 = vld [vmem:[#allocation5 + $0x200] sm:$0xff] }
  0x7c   :  { %470 = vmatprep.subr.mxu0 %v212_v3  ;;  %540 = vmatpush2.msra.mxu1 %v310_v4  ;;  %v283_v40 = vld [vmem:[#allocation5 + $0x510] sm:$0xff]  ;;  %v184_v41 = vld [vmem:[#allocation5 + $0x1f8] sm:$0xff]  ;;  %v281_v42 = vld [vmem:[#allocation5 + $0x500] sm:$0xff] }
  0x7d   :  { %471 = vmatpush2.msra.mxu0 %v211_v5  ;;  %541 = vmatprep.subr.mxu1 %v308_v6  ;;  %v182_v43 = vld [vmem:[#allocation5 + $0x1e8] sm:$0xff]  ;;  %v280_v44 = vld [vmem:[#allocation5 + $0x4f8] sm:$0xff]  ;;  %v181_v45 = vld [vmem:[#allocation5 + $0x1e0] sm:$0xff] }
  0x7e   :  { %472 = vmatprep.subr.mxu0 %v209_v7  ;;  %542 = vmatpush2.msra.mxu1 %v307_v8  ;;  %v278_v46 = vld [vmem:[#allocation5 + $0x4e8] sm:$0xff]  ;;  %v179_v47 = vld [vmem:[#allocation5 + $0x1d0] sm:$0xff]  ;;  %v277_v48 = vld [vmem:[#allocation5 + $0x4e0] sm:$0xff] }
  0x7f   :  { %473 = vmatpush2.msra.mxu0 %v208_v9  ;;  %543 = vmatprep.subr.mxu1 %v305_v10  ;;  %v178_v49 = vld [vmem:[#allocation5 + $0x1c8] sm:$0xff]  ;;  %v275_v50 = vld [vmem:[#allocation5 + $0x4d0] sm:$0xff]  ;;  %v176_v51 = vld [vmem:[#allocation5 + $0x1b8] sm:$0xff] }
  0x80   :  { %474 = vmatprep.subr.mxu0 %v206_v11  ;;  %544 = vmatpush2.msra.mxu1 %v304_v12  ;;  %v274_v52 = vld [vmem:[#allocation5 + $0x4c8] sm:$0xff]  ;;  %v175_v53 = vld [vmem:[#allocation5 + $0x1b0] sm:$0xff]  ;;  %v272_v54 = vld [vmem:[#allocation5 + $0x4b8] sm:$0xff] }
  0x81   :  { %475 = vmatpush2.msra.mxu0 %v205_v13  ;;  %545 = vmatprep.subr.mxu1 %v302_v14  ;;  %v173_v55 = vld [vmem:[#allocation5 + $0x1a0] sm:$0xff]  ;;  %v271_v56 = vld [vmem:[#allocation5 + $0x4b0] sm:$0xff]  ;;  %v172_v57 = vld [vmem:[#allocation5 + $0x198] sm:$0xff] }
  0x82   :  { %476 = vmatprep.subr.mxu0 %v203_v15  ;;  %546 = vmatpush2.msra.mxu1 %v301_v16  ;;  %v269_v58 = vld [vmem:[#allocation5 + $0x4a0] sm:$0xff]  ;;  %v170_v59 = vld [vmem:[#allocation5 + $0x188] sm:$0xff]  ;;  %v1828_v60 = vld [vmem:[#allocation2 + $0x8] sm:$0xff] }
  0x83   :  { %477 = vmatpush2.msra.mxu0 %v202_v17  ;;  %547 = vmatprep.subr.mxu1 %v299_v18  ;;  %v169_v61 = vld [vmem:[#allocation5 + $0x180] sm:$0xff]  ;;  %v268_v62 = vld [vmem:[#allocation5 + $0x498] sm:$0xff]  ;;  %v1830_v63 = vld [vmem:[#allocation2] sm:$0xff] }
  0x84   :  { %478 = vmatprep.subr.mxu0 %v200_v19  ;;  %548 = vmatpush2.msra.mxu1 %v298_v20  ;;  %v266_v0 = vld [vmem:[#allocation5 + $0x488] sm:$0xff]  ;;  %v359_v1 = vld [vmem:[#allocation5 + $0x770] sm:$0xff]  ;;  %v265_v2 = vld [vmem:[#allocation5 + $0x480] sm:$0xff] }
  0x85   :  { %479 = vmatpush2.msra.mxu0 %v199_v21  ;;  %549 = vmatprep.subr.mxu1 %v296_v22  ;;  %v1833_v3 = vld [vmem:[#allocation2 + $0x18] sm:$0xff]  ;;  %v358_v4 = vld [vmem:[#allocation5 + $0x768] sm:$0xff]  ;;  %v1836_v5 = vld [vmem:[#allocation2 + $0x10] sm:$0xff] }
  0x86   :  { %480 = vmatprep.subr.mxu0 %v197_v23  ;;  %550 = vmatpush2.msra.mxu1 %v295_v24  ;;  %v356_v6 = vld [vmem:[#allocation5 + $0x758] sm:$0xff]  ;;  %v355_v7 = vld [vmem:[#allocation5 + $0x750] sm:$0xff]  ;;  %v353_v9 = vld [vmem:[#allocation5 + $0x740] sm:$0xff] }
  0x87   :  { %481 = vmatpush2.msra.mxu0 %v196_v25  ;;  %551 = vmatprep.subr.mxu1 %v293_v26  ;;  %v216_v8 = vld [vmem:[#allocation5 + $0x2f8] sm:$0xff]  ;;  %v213_v12 = vld [vmem:[#allocation5 + $0x2e0] sm:$0xff]  ;;  %v350_v13 = vld [vmem:[#allocation5 + $0x728] sm:$0xff] }
  0x88   :  { %482 = vmatprep.subr.mxu0 %v194_v27  ;;  %552 = vmatpush2.msra.mxu1 %v292_v28  ;;  %v168_v10 = vld [vmem:[#allocation5 + $0x178] sm:$0xff]  ;;  %v165_v14 = vld [vmem:[#allocation5 + $0x160] sm:$0xff]  ;;  %v210_v16 = vld [vmem:[#allocation5 + $0x2c8] sm:$0xff] }
  0x89   :  { %483 = vmatpush2.msra.mxu0 %v193_v29  ;;  %553 = vmatprep.subr.mxu1 %v290_v30  ;;  %v352_v11 = vld [vmem:[#allocation5 + $0x738] sm:$0xff]  ;;  %v349_v15 = vld [vmem:[#allocation5 + $0x720] sm:$0xff]  ;;  %v347_v17 = vld [vmem:[#allocation5 + $0x710] sm:$0xff] }
  0x8a   :  { %484 = vmatprep.subr.mxu0 %v191_v31  ;;  %554 = vmatpush2.msra.mxu1 %v289_v32  ;;  %v162_v18 = vld [vmem:[#allocation5 + $0x148] sm:$0xff]  ;;  %v207_v20 = vld [vmem:[#allocation5 + $0x2b0] sm:$0xff]  ;;  %v344_v21 = vld [vmem:[#allocation5 + $0x6f8] sm:$0xff] }
  0x8b   :  { %485 = vmatpush2.msra.mxu0 %v190_v33  ;;  %555 = vmatprep.subr.mxu1 %v287_v34  ;;  %v346_v19 = vld [vmem:[#allocation5 + $0x708] sm:$0xff]  ;;  %v159_v22 = vld [vmem:[#allocation5 + $0x130] sm:$0xff]  ;;  %v204_v24 = vld [vmem:[#allocation5 + $0x298] sm:$0xff] }
  0x8c   :  { %486 = vmatprep.subr.mxu0 %v188_v35  ;;  %556 = vmatpush2.msra.mxu1 %v286_v36  ;;  %v343_v23 = vld [vmem:[#allocation5 + $0x6f0] sm:$0xff]  ;;  %v341_v25 = vld [vmem:[#allocation5 + $0x6e0] sm:$0xff]  ;;  %v156_v26 = vld [vmem:[#allocation5 + $0x118] sm:$0xff] }
  0x8d   :  { %487 = vmatpush2.msra.mxu0 %v187_v37  ;;  %557 = vmatprep.subr.mxu1 %v284_v38  ;;  %v340_v27 = vld [vmem:[#allocation5 + $0x6d8] sm:$0xff]  ;;  %v201_v28 = vld [vmem:[#allocation5 + $0x280] sm:$0xff]  ;;  %v338_v29 = vld [vmem:[#allocation5 + $0x6c8] sm:$0xff] }
  0x8e   :  { %488 = vmatprep.subr.mxu0 %v185_v39  ;;  %558 = vmatpush2.msra.mxu1 %v283_v40  ;;  %v153_v30 = vld [vmem:[#allocation5 + $0x100] sm:$0xff]  ;;  %v198_v32 = vld [vmem:[#allocation5 + $0x268] sm:$0xff]  ;;  %v335_v33 = vld [vmem:[#allocation5 + $0x6b0] sm:$0xff] }
  0x8f   :  { %489 = vmatpush2.msra.mxu0 %v184_v41  ;;  %559 = vmatprep.subr.mxu1 %v281_v42  ;;  %v337_v31 = vld [vmem:[#allocation5 + $0x6c0] sm:$0xff]  ;;  %v150_v34 = vld [vmem:[#allocation5 + $0xe8] sm:$0xff]  ;;  %v195_v36 = vld [vmem:[#allocation5 + $0x250] sm:$0xff] }
  0x90   :  { %490 = vmatprep.subr.mxu0 %v182_v43  ;;  %560 = vmatpush2.msra.mxu1 %v280_v44  ;;  %v334_v35 = vld [vmem:[#allocation5 + $0x6a8] sm:$0xff]  ;;  %v332_v37 = vld [vmem:[#allocation5 + $0x698] sm:$0xff]  ;;  %v147_v38 = vld [vmem:[#allocation5 + $0xd0] sm:$0xff] }
  0x91   :  { %491 = vmatpush2.msra.mxu0 %v181_v45  ;;  %561 = vmatprep.subr.mxu1 %v278_v46  ;;  %v331_v39 = vld [vmem:[#allocation5 + $0x690] sm:$0xff]  ;;  %v192_v40 = vld [vmem:[#allocation5 + $0x238] sm:$0xff]  ;;  %v329_v41 = vld [vmem:[#allocation5 + $0x680] sm:$0xff] }
  0x92   :  { %492 = vmatprep.subr.mxu0 %v179_v47  ;;  %562 = vmatpush2.msra.mxu1 %v277_v48  ;;  %v144_v42 = vld [vmem:[#allocation5 + $0xb8] sm:$0xff]  ;;  %v189_v44 = vld [vmem:[#allocation5 + $0x220] sm:$0xff]  ;;  %v326_v45 = vld [vmem:[#allocation5 + $0x668] sm:$0xff] }
  0x93   :  { %493 = vmatpush2.msra.mxu0 %v178_v49  ;;  %563 = vmatprep.subr.mxu1 %v275_v50  ;;  %v328_v43 = vld [vmem:[#allocation5 + $0x678] sm:$0xff]  ;;  %v141_v46 = vld [vmem:[#allocation5 + $0xa0] sm:$0xff]  ;;  %v186_v48 = vld [vmem:[#allocation5 + $0x208] sm:$0xff] }
  0x94   :  { %494 = vmatprep.subr.mxu0 %v176_v51  ;;  %564 = vmatpush2.msra.mxu1 %v274_v52  ;;  %v325_v47 = vld [vmem:[#allocation5 + $0x660] sm:$0xff]  ;;  %v323_v49 = vld [vmem:[#allocation5 + $0x650] sm:$0xff]  ;;  %v138_v50 = vld [vmem:[#allocation5 + $0x88] sm:$0xff] }
  0x95   :  { %495 = vmatpush2.msra.mxu0 %v175_v53  ;;  %565 = vmatprep.subr.mxu1 %v272_v54  ;;  %v322_v51 = vld [vmem:[#allocation5 + $0x648] sm:$0xff]  ;;  %v183_v52 = vld [vmem:[#allocation5 + $0x1f0] sm:$0xff]  ;;  %v320_v53 = vld [vmem:[#allocation5 + $0x638] sm:$0xff] }
  0x96   :  { %496 = vmatprep.subr.mxu0 %v173_v55  ;;  %566 = vmatpush2.msra.mxu1 %v271_v56  ;;  %v135_v54 = vld [vmem:[#allocation5 + $0x70] sm:$0xff]  ;;  %v180_v56 = vld [vmem:[#allocation5 + $0x1d8] sm:$0xff] }
  0x97   :  { %497 = vmatpush2.msra.mxu0 %v172_v57  ;;  %567 = vmatprep.subr.mxu1 %v269_v58  ;;  %v319_v55 = vld [vmem:[#allocation5 + $0x630] sm:$0xff]  ;;  %v317_v57 = vld [vmem:[#allocation5 + $0x620] sm:$0xff]  ;;  %v132_v58 = vld [vmem:[#allocation5 + $0x58] sm:$0xff] }
  0x98   :  { %498 = vmatprep.subr.mxu0 %v170_v59  ;;  %500 = vmatprep.mubr.f32.mxu0 %v1828_v60  ;;  %v316_v59 = vld [vmem:[#allocation5 + $0x618] sm:$0xff] }
  0x99   :  { %499 = vmatpush2.msra.mxu0 %v169_v61  ;;  %568 = vmatpush2.msra.mxu1 %v268_v62  ;;  %v177_v61 = vld [vmem:[#allocation5 + $0x1c0] sm:$0xff]  ;;  %v314_v62 = vld [vmem:[#allocation5 + $0x608] sm:$0xff] }
  0x9a   :  { %501 = vmatmul.mubr.f32.vlgmr.msra.gmra.mxu0 %v1830_v63  ;;  %569 = vmatprep.subr.mxu1 %v266_v0  ;;  %v129_v0 = vld [vmem:[#allocation5 + $0x40] sm:$0xff] }
  0x9b   :  { %578 = vmatprep.subr.mxu0 %v359_v1  ;;  %570 = vmatpush2.msra.mxu1 %v265_v2  ;;  %v313_v1 = vld [vmem:[#allocation5 + $0x600] sm:$0xff]  ;;  %v174_v2 = vld [vmem:[#allocation5 + $0x1a8] sm:$0xff] }
  0x9c   :  { %571 = vmatprep.mubr.f32.mxu1 %v1833_v3  ;;  %579 = vmatpush1.msra.mxu0 %v358_v4  ;;  %v407_v4 = vld [vmem:[#allocation5 + $0x8f0] sm:$0xff] }
  0x9d   :  { %572 = vmatmul.mubr.f32.vlgmr.msra.gmra.mxu1 %v1836_v5  ;;  %580 = vmatprep.subr.mxu0 %v356_v6  ;;  %v126_v6 = vld [vmem:[#allocation5 + $0x28] sm:$0xff] }
  0x9e   :  { %581 = vmatpush1.msra.mxu0 %v355_v7  ;;  %1315 = vmatprep.subr.mxu1 %v216_v8  ;;  %v406_v7 = vld [vmem:[#allocation5 + $0x8e8] sm:$0xff]  ;;  %v171_v8 = vld [vmem:[#allocation5 + $0x190] sm:$0xff] }
  0x9f   :  { %582 = vmatprep.subr.mxu0 %v353_v9  ;;  %1316 = vmatpush3.msra.mxu1 %v168_v10  ;;  %v404_v9 = vld [vmem:[#allocation5 + $0x8d8] sm:$0xff]  ;;  %v123_v10 = vld [vmem:[#allocation5 + $0x10] sm:$0xff] }
  0xa0   :  { %583 = vmatpush1.msra.mxu0 %v352_v11  ;;  %1317 = vmatprep.subr.mxu1 %v213_v12  ;;  %v403_v11 = vld [vmem:[#allocation5 + $0x8d0] sm:$0xff]  ;;  %v312_v12 = vld [vmem:[#allocation5 + $0x5f8] sm:$0xff] }
  0xa1   :  { %584 = vmatprep.subr.mxu0 %v350_v13  ;;  %1318 = vmatpush3.msra.mxu1 %v165_v14  ;;  %v401_v13 = vld [vmem:[#allocation5 + $0x8c0] sm:$0xff]  ;;  %v400_v14 = vld [vmem:[#allocation5 + $0x8b8] sm:$0xff] }
  0xa2   :  { %585 = vmatpush1.msra.mxu0 %v349_v15  ;;  %1319 = vmatprep.subr.mxu1 %v210_v16  ;;  %v264_v15 = vld [vmem:[#allocation5 + $0x478] sm:$0xff]  ;;  %v398_v16 = vld [vmem:[#allocation5 + $0x8a8] sm:$0xff] }
  0xa3   :  { %586 = vmatprep.subr.mxu0 %v347_v17  ;;  %1320 = vmatpush3.msra.mxu1 %v162_v18  ;;  %v309_v17 = vld [vmem:[#allocation5 + $0x5e0] sm:$0xff] }
  0xa4   :  { %587 = vmatpush1.msra.mxu0 %v346_v19  ;;  %1321 = vmatprep.subr.mxu1 %v207_v20  ;;  %v397_v18 = vld [vmem:[#allocation5 + $0x8a0] sm:$0xff]  ;;  %v395_v20 = vld [vmem:[#allocation5 + $0x890] sm:$0xff] }
  0xa5   :  { %588 = vmatprep.subr.mxu0 %v344_v21  ;;  %1322 = vmatpush3.msra.mxu1 %v159_v22  ;;  %v261_v19 = vld [vmem:[#allocation5 + $0x460] sm:$0xff]  ;;  %v306_v21 = vld [vmem:[#allocation5 + $0x5c8] sm:$0xff] }
  0xa6   :  { %589 = vmatpush1.msra.mxu0 %v343_v23  ;;  %1323 = vmatprep.subr.mxu1 %v204_v24  ;;  %v394_v22 = vld [vmem:[#allocation5 + $0x888] sm:$0xff]  ;;  %v392_v24 = vld [vmem:[#allocation5 + $0x878] sm:$0xff] }
  0xa7   :  { %590 = vmatprep.subr.mxu0 %v341_v25  ;;  %1324 = vmatpush3.msra.mxu1 %v156_v26  ;;  %v258_v23 = vld [vmem:[#allocation5 + $0x448] sm:$0xff]  ;;  %v391_v25 = vld [vmem:[#allocation5 + $0x870] sm:$0xff] }
  0xa8   :  { %591 = vmatpush1.msra.mxu0 %v340_v27  ;;  %1325 = vmatprep.subr.mxu1 %v201_v28  ;;  %v255_v26 = vld [vmem:[#allocation5 + $0x430] sm:$0xff]  ;;  %v389_v27 = vld [vmem:[#allocation5 + $0x860] sm:$0xff]  ;;  %v388_v28 = vld [vmem:[#allocation5 + $0x858] sm:$0xff] }
  0xa9   :  { %592 = vmatprep.subr.mxu0 %v338_v29  ;;  %1326 = vmatpush3.msra.mxu1 %v153_v30  ;;  %v252_v29 = vld [vmem:[#allocation5 + $0x418] sm:$0xff]  ;;  %v386_v30 = vld [vmem:[#allocation5 + $0x848] sm:$0xff] }
  0xaa   :  { %593 = vmatpush1.msra.mxu0 %v337_v31  ;;  %1327 = vmatprep.subr.mxu1 %v198_v32  ;;  %v297_v31 = vld [vmem:[#allocation5 + $0x580] sm:$0xff] }
  0xab   :  { %594 = vmatprep.subr.mxu0 %v335_v33  ;;  %1328 = vmatpush3.msra.mxu1 %v150_v34  ;;  %v385_v32 = vld [vmem:[#allocation5 + $0x840] sm:$0xff]  ;;  %v383_v34 = vld [vmem:[#allocation5 + $0x830] sm:$0xff] }
  0xac   :  { %595 = vmatpush1.msra.mxu0 %v334_v35  ;;  %1329 = vmatprep.subr.mxu1 %v195_v36  ;;  %v249_v33 = vld [vmem:[#allocation5 + $0x400] sm:$0xff]  ;;  %v294_v35 = vld [vmem:[#allocation5 + $0x568] sm:$0xff] }
  0xad   :  { %596 = vmatprep.subr.mxu0 %v332_v37  ;;  %1330 = vmatpush3.msra.mxu1 %v147_v38  ;;  %v382_v36 = vld [vmem:[#allocation5 + $0x828] sm:$0xff]  ;;  %v380_v38 = vld [vmem:[#allocation5 + $0x818] sm:$0xff] }
  0xae   :  { %597 = vmatpush1.msra.mxu0 %v331_v39  ;;  %1331 = vmatprep.subr.mxu1 %v192_v40  ;;  %v246_v37 = vld [vmem:[#allocation5 + $0x3e8] sm:$0xff]  ;;  %v291_v39 = vld [vmem:[#allocation5 + $0x550] sm:$0xff] }
  0xaf   :  { %598 = vmatprep.subr.mxu0 %v329_v41  ;;  %1332 = vmatpush3.msra.mxu1 %v144_v42  ;;  %v379_v40 = vld [vmem:[#allocation5 + $0x810] sm:$0xff]  ;;  %v377_v42 = vld [vmem:[#allocation5 + $0x800] sm:$0xff] }
  0xb0   :  { %599 = vmatpush1.msra.mxu0 %v328_v43  ;;  %1333 = vmatprep.subr.mxu1 %v189_v44  ;;  %v243_v41 = vld [vmem:[#allocation5 + $0x3d0] sm:$0xff]  ;;  %v288_v43 = vld [vmem:[#allocation5 + $0x538] sm:$0xff] }
  0xb1   :  { %600 = vmatprep.subr.mxu0 %v326_v45  ;;  %1334 = vmatpush3.msra.mxu1 %v141_v46  ;;  %v376_v44 = vld [vmem:[#allocation5 + $0x7f8] sm:$0xff]  ;;  %v374_v46 = vld [vmem:[#allocation5 + $0x7e8] sm:$0xff] }
  0xb2   :  { %601 = vmatpush1.msra.mxu0 %v325_v47  ;;  %1335 = vmatprep.subr.mxu1 %v186_v48  ;;  %v240_v45 = vld [vmem:[#allocation5 + $0x3b8] sm:$0xff]  ;;  %v285_v47 = vld [vmem:[#allocation5 + $0x520] sm:$0xff] }
  0xb3   :  { %602 = vmatprep.subr.mxu0 %v323_v49  ;;  %1336 = vmatpush3.msra.mxu1 %v138_v50  ;;  %v373_v48 = vld [vmem:[#allocation5 + $0x7e0] sm:$0xff]  ;;  %v371_v50 = vld [vmem:[#allocation5 + $0x7d0] sm:$0xff] }
  0xb4   :  { %603 = vmatpush1.msra.mxu0 %v322_v51  ;;  %1337 = vmatprep.subr.mxu1 %v183_v52  ;;  %v237_v49 = vld [vmem:[#allocation5 + $0x3a0] sm:$0xff]  ;;  %v282_v51 = vld [vmem:[#allocation5 + $0x508] sm:$0xff] }
  0xb5   :  { %604 = vmatprep.subr.mxu0 %v320_v53  ;;  %1338 = vmatpush3.msra.mxu1 %v135_v54  ;;  %v370_v52 = vld [vmem:[#allocation5 + $0x7c8] sm:$0xff]  ;;  %v368_v54 = vld [vmem:[#allocation5 + $0x7b8] sm:$0xff] }
  0xb6   :  { %605 = vmatpush1.msra.mxu0 %v319_v55  ;;  %1339 = vmatprep.subr.mxu1 %v180_v56  ;;  %v234_v53 = vld [vmem:[#allocation5 + $0x388] sm:$0xff]  ;;  %v279_v55 = vld [vmem:[#allocation5 + $0x4f0] sm:$0xff] }
  0xb7   :  { %606 = vmatprep.subr.mxu0 %v317_v57  ;;  %1340 = vmatpush3.msra.mxu1 %v132_v58  ;;  %v367_v56 = vld [vmem:[#allocation5 + $0x7b0] sm:$0xff]  ;;  %v365_v58 = vld [vmem:[#allocation5 + $0x7a0] sm:$0xff] }
  0xb8   :  { %607 = vmatpush1.msra.mxu0 %v316_v59  ;;  %1341 = vmatprep.subr.mxu1 %v177_v61  ;;  %v231_v57 = vld [vmem:[#allocation5 + $0x370] sm:$0xff]  ;;  %v276_v59 = vld [vmem:[#allocation5 + $0x4d8] sm:$0xff] }
  0xb9   :  { %608 = vmatprep.subr.mxu0 %v314_v62  ;;  %1342 = vmatpush3.msra.mxu1 %v129_v0  ;;  %v364_v61 = vld [vmem:[#allocation5 + $0x798] sm:$0xff]  ;;  %v362_v0 = vld [vmem:[#allocation5 + $0x788] sm:$0xff] }
  0xba   :  { %609 = vmatpush1.msra.mxu0 %v313_v1  ;;  %1343 = vmatprep.subr.mxu1 %v174_v2  ;;  %v228_v62 = vld [vmem:[#allocation5 + $0x358] sm:$0xff]  ;;  %v273_v1 = vld [vmem:[#allocation5 + $0x4c0] sm:$0xff] }
  0xbb   :  { %610 = vmatprep.subr.mxu0 %v407_v4  ;;  %1344 = vmatpush3.msra.mxu1 %v126_v6  ;;  %v361_v2 = vld [vmem:[#allocation5 + $0x780] sm:$0xff]  ;;  %v119_v6 = vld [vmem:[#allocation2 + $0x28] sm:$0xff] }
  0xbc   :  { %611 = vmatpush2.msra.mxu0 %v406_v7  ;;  %1345 = vmatprep.subr.mxu1 %v171_v8  ;;  %v225_v4 = vld [vmem:[#allocation5 + $0x340] sm:$0xff]  ;;  %v270_v7 = vld [vmem:[#allocation5 + $0x4a8] sm:$0xff] }
  0xbd   :  { %612 = vmatprep.subr.mxu0 %v404_v9  ;;  %1346 = vmatpush3.msra.mxu1 %v123_v10  ;;  %v1842_v8 = vld [vmem:[#allocation2 + $0x20] sm:$0xff]  ;;  %v413_v9 = vld [vmem:[#allocation5 + $0x920] sm:$0xff] }
  0xbe   :  { %613 = vmatpush2.msra.mxu0 %v403_v11  ;;  %784 = vmatprep.mubr.f32.mxu1 %v1828_v60  ;;  %v303_v60 = vld [vmem:[#allocation5 + $0x5b0] sm:$0xff]  ;;  %v222_v10 = vld [vmem:[#allocation5 + $0x328] sm:$0xff]  ;;  %v412_v11 = vld [vmem:[#allocation5 + $0x918] sm:$0xff] }
  0xbf   :  { %1350 = vmatprep.subr.mxu1 %v312_v12  ;;  %614 = vmatprep.subr.mxu0 %v401_v13  ;;  %v267_v12 = vld [vmem:[#allocation5 + $0x490] sm:$0xff]  ;;  %v410_v13 = vld [vmem:[#allocation5 + $0x908] sm:$0xff] }
  0xc0   :  { %785 = vmatmul.mubr.f32.vlgmr.msra.gmra.mxu1 %v1830_v63  ;;  %615 = vmatpush2.msra.mxu0 %v400_v14  ;;  %v300_v63 = vld [vmem:[#allocation5 + $0x598] sm:$0xff]  ;;  %v219_v14 = vld [vmem:[#allocation5 + $0x310] sm:$0xff] }
  0xc1   :  { %1351 = vmatpush3.msra.mxu1 %v264_v15  ;;  %616 = vmatprep.subr.mxu0 %v398_v16  ;;  %v409_v15 = vld [vmem:[#allocation5 + $0x900] sm:$0xff]  ;;  %v120_v16 = vld [vmem:[#allocation2 + $0x30] sm:$0xff] }
  0xc2   :  { %1352 = vmatprep.subr.mxu1 %v309_v17  ;;  %617 = vmatpush2.msra.mxu0 %v397_v18  ;;  %v408_v17 = vld [vmem:[#allocation5 + $0x8f8] sm:$0xff] }
  0xc3   :  { %1353 = vmatpush3.msra.mxu1 %v261_v19  ;;  %618 = vmatprep.subr.mxu0 %v395_v20  ;;  %v360_v18 = vld [vmem:[#allocation5 + $0x778] sm:$0xff]  ;;  %v1764_v19 = vmov 0.0   ;;  %v405_v20 = vld [vmem:[#allocation5 + $0x8e0] sm:$0xff] }
  0xc4   :  { %1354 = vmatprep.subr.mxu1 %v306_v21  ;;  %619 = vmatpush2.msra.mxu0 %v394_v22  ;;  %v357_v21 = vld [vmem:[#allocation5 + $0x760] sm:$0xff]  ;;  %v414_v22 = vld [vmem:[#allocation5 + $0x928] sm:$0xff] }
  0xc5   :  { %1355 = vmatpush3.msra.mxu1 %v258_v23  ;;  %620 = vmatprep.subr.mxu0 %v392_v24  ;;  %v402_v23 = vld [vmem:[#allocation5 + $0x8c8] sm:$0xff] }
  0xc6   :  { %1356 = vmatprep.subr.mxu1 %v303_v60  ;;  %621 = vmatpush2.msra.mxu0 %v391_v25  ;;  %v354_v24 = vld [vmem:[#allocation5 + $0x748] sm:$0xff]  ;;  %v399_v60 = vld [vmem:[#allocation5 + $0x8b0] sm:$0xff] }
  0xc7   :  { %1357 = vmatpush3.msra.mxu1 %v255_v26  ;;  %622 = vmatprep.subr.mxu0 %v389_v27  ;;  %v351_v25 = vld [vmem:[#allocation5 + $0x730] sm:$0xff]  ;;  %v348_v27 = vld [vmem:[#allocation5 + $0x718] sm:$0xff] }
  0xc8   :  { %1358 = vmatprep.subr.mxu1 %v300_v63  ;;  %623 = vmatpush2.msra.mxu0 %v388_v28  ;;  %v1034_v26 = vld [vmem:[#allocation8 + $0xf8] sm:$0xff]  ;;  %v393_v28 = vld [vmem:[#allocation5 + $0x880] sm:$0xff] }
  0xc9   :  { %1359 = vmatpush3.msra.mxu1 %v252_v29  ;;  %624 = vmatprep.subr.mxu0 %v386_v30  ;;  %v1018_v63 = vld [vmem:[#allocation8 + $0x78] sm:$0xff]  ;;  %v1033_v29 = vld [vmem:[#allocation8 + $0xf0] sm:$0xff] }
  0xca   :  { %1360 = vmatprep.subr.mxu1 %v297_v31  ;;  %625 = vmatpush2.msra.mxu0 %v385_v32  ;;  %v345_v30 = vld [vmem:[#allocation5 + $0x700] sm:$0xff]  ;;  %v390_v32 = vld [vmem:[#allocation5 + $0x868] sm:$0xff] }
  0xcb   :  { %1361 = vmatpush3.msra.mxu1 %v249_v33  ;;  %626 = vmatprep.subr.mxu0 %v383_v34  ;;  %v1017_v31 = vld [vmem:[#allocation8 + $0x70] sm:$0xff]  ;;  %v1032_v33 = vld [vmem:[#allocation8 + $0xe8] sm:$0xff] }
  0xcc   :  { %1362 = vmatprep.subr.mxu1 %v294_v35  ;;  %627 = vmatpush2.msra.mxu0 %v382_v36  ;;  %v342_v34 = vld [vmem:[#allocation5 + $0x6e8] sm:$0xff]  ;;  %v1016_v35 = vld [vmem:[#allocation8 + $0x68] sm:$0xff]  ;;  %v387_v36 = vld [vmem:[#allocation5 + $0x850] sm:$0xff] }
  0xcd   :  { %1363 = vmatpush3.msra.mxu1 %v246_v37  ;;  %628 = vmatprep.subr.mxu0 %v380_v38  ;;  %v1031_v37 = vld [vmem:[#allocation8 + $0xe0] sm:$0xff] }
  0xce   :  { %1364 = vmatprep.subr.mxu1 %v291_v39  ;;  %629 = vmatpush2.msra.mxu0 %v379_v40  ;;  %v339_v38 = vld [vmem:[#allocation5 + $0x6d0] sm:$0xff]  ;;  %v384_v40 = vld [vmem:[#allocation5 + $0x838] sm:$0xff] }
  0xcf   :  { %1365 = vmatpush3.msra.mxu1 %v243_v41  ;;  %630 = vmatprep.subr.mxu0 %v377_v42  ;;  %v1015_v39 = vld [vmem:[#allocation8 + $0x60] sm:$0xff]  ;;  %v1030_v41 = vld [vmem:[#allocation8 + $0xd8] sm:$0xff] }
  0xd0   :  { %1366 = vmatprep.subr.mxu1 %v288_v43  ;;  %631 = vmatpush2.msra.mxu0 %v376_v44  ;;  %v336_v42 = vld [vmem:[#allocation5 + $0x6b8] sm:$0xff]  ;;  %v1014_v43 = vld [vmem:[#allocation8 + $0x58] sm:$0xff]  ;;  %v381_v44 = vld [vmem:[#allocation5 + $0x820] sm:$0xff] }
  0xd1   :  { %1367 = vmatpush3.msra.mxu1 %v240_v45  ;;  %632 = vmatprep.subr.mxu0 %v374_v46  ;;  %v1029_v45 = vld [vmem:[#allocation8 + $0xd0] sm:$0xff] }
  0xd2   :  { %1368 = vmatprep.subr.mxu1 %v285_v47  ;;  %633 = vmatpush2.msra.mxu0 %v373_v48  ;;  %v333_v46 = vld [vmem:[#allocation5 + $0x6a0] sm:$0xff]  ;;  %v378_v48 = vld [vmem:[#allocation5 + $0x808] sm:$0xff] }
  0xd3   :  { %1369 = vmatpush3.msra.mxu1 %v237_v49  ;;  %634 = vmatprep.subr.mxu0 %v371_v50  ;;  %v1013_v47 = vld [vmem:[#allocation8 + $0x50] sm:$0xff]  ;;  %v1028_v49 = vld [vmem:[#allocation8 + $0xc8] sm:$0xff] }
  0xd4   :  { %1370 = vmatprep.subr.mxu1 %v282_v51  ;;  %635 = vmatpush2.msra.mxu0 %v370_v52  ;;  %v330_v50 = vld [vmem:[#allocation5 + $0x688] sm:$0xff]  ;;  %v1012_v51 = vld [vmem:[#allocation8 + $0x48] sm:$0xff]  ;;  %v375_v52 = vld [vmem:[#allocation5 + $0x7f0] sm:$0xff] }
  0xd5   :  { %1371 = vmatpush3.msra.mxu1 %v234_v53  ;;  %636 = vmatprep.subr.mxu0 %v368_v54  ;;  %v1027_v53 = vld [vmem:[#allocation8 + $0xc0] sm:$0xff] }
  0xd6   :  { %1372 = vmatprep.subr.mxu1 %v279_v55  ;;  %637 = vmatpush2.msra.mxu0 %v367_v56  ;;  %v327_v54 = vld [vmem:[#allocation5 + $0x670] sm:$0xff]  ;;  %v372_v56 = vld [vmem:[#allocation5 + $0x7d8] sm:$0xff] }
  0xd7   :  { %1373 = vmatpush3.msra.mxu1 %v231_v57  ;;  %638 = vmatprep.subr.mxu0 %v365_v58  ;;  %v1011_v55 = vld [vmem:[#allocation8 + $0x40] sm:$0xff]  ;;  %v1026_v57 = vld [vmem:[#allocation8 + $0xb8] sm:$0xff] }
  0xd8   :  { %1374 = vmatprep.subr.mxu1 %v276_v59  ;;  %639 = vmatpush2.msra.mxu0 %v364_v61  ;;  %v324_v58 = vld [vmem:[#allocation5 + $0x658] sm:$0xff]  ;;  %v1010_v59 = vld [vmem:[#allocation8 + $0x38] sm:$0xff]  ;;  %v369_v61 = vld [vmem:[#allocation5 + $0x7c0] sm:$0xff] }
  0xd9   :  { %1375 = vmatpush3.msra.mxu1 %v228_v62  ;;  %640 = vmatprep.subr.mxu0 %v362_v0  ;;  %v1025_v62 = vld [vmem:[#allocation8 + $0xb0] sm:$0xff] }
  0xda   :  { %1376 = vmatprep.subr.mxu1 %v273_v1  ;;  %641 = vmatpush2.msra.mxu0 %v361_v2  ;;  %v321_v0 = vld [vmem:[#allocation5 + $0x640] sm:$0xff]  ;;  %v366_v1 = vld [vmem:[#allocation5 + $0x7a8] sm:$0xff] }
  0xdb   :  { %1377 = vmatpush3.msra.mxu1 %v225_v4  ;;  %642 = vmatprep.mubr.f32.mxu0 %v119_v6  ;;  %v318_v2 = vld [vmem:[#allocation5 + $0x628] sm:$0xff]  ;;  %v363_v4 = vld [vmem:[#allocation5 + $0x790] sm:$0xff] }
  0xdc   :  { %1378 = vmatprep.subr.mxu1 %v270_v7  ;;  %643 = vmatmul.mubr.f32.vlgmr.msra.gmra.mxu0 %v1842_v8  ;;  %v1009_v7 = vld [vmem:[#allocation8 + $0x30] sm:$0xff] }
  0xdd   :  { %677 = vmatprep.subr.mxu0 %v413_v9  ;;  %1379 = vmatpush3.msra.mxu1 %v222_v10  ;;  %v1024_v9 = vld [vmem:[#allocation8 + $0xa8] sm:$0xff] }
  0xde   :  { %678 = vmatpush1.msra.mxu0 %v412_v11  ;;  %1380 = vmatprep.subr.mxu1 %v267_v12  ;;  %v1008_v10 = vld [vmem:[#allocation8 + $0x28] sm:$0xff]  ;;  %v1023_v11 = vld [vmem:[#allocation8 + $0xa0] sm:$0xff] }
  0xdf   :  { %679 = vmatprep.subr.mxu0 %v410_v13  ;;  %1381 = vmatpush3.msra.mxu1 %v219_v14  ;;  %v1007_v12 = vld [vmem:[#allocation8 + $0x20] sm:$0xff]  ;;  %v1022_v13 = vld [vmem:[#allocation8 + $0x98] sm:$0xff] }
  0xe0   :  { %854 = vmatprep.mubr.f32.mxu1 %v1833_v3  ;;  %680 = vmatpush1.msra.mxu0 %v409_v15  ;;  %v411_v3 = vld [vmem:[#allocation5 + $0x910] sm:$0xff]  ;;  %v1021_v15 = vld [vmem:[#allocation8 + $0x90] sm:$0xff] }
  0xe1   :  { %713 = vmatprep.mubr.f32.mxu0 %v1764_v19  ;;  %855 = vmatmul.mubr.f32.vlgmr.msra.gmra.mxu1 %v1836_v5  ;;  %v396_v5 = vld [vmem:[#allocation5 + $0x898] sm:$0xff]  ;;  %v1006_v14 = vld [vmem:[#allocation8 + $0x18] sm:$0xff] }
  0xe2   :  { %1311 = vmatmul.mubr.msk.f32.vlgmr.msra.gmra.mxu0 %vm432_vm0, %v120_v16  ;;  %1385 = vmatprep.subr.mxu0 %v408_v17  ;;  %v1004_v17 = vld [vmem:[#allocation8 + $0x8] sm:$0xff] }
  0xe3   :  { %1386 = vmatpush3.msra.mxu0 %v360_v18  ;;  %924 = vmatprep.mubr.f32.mxu0 %v119_v6  ;;  %v315_v6 = vld [vmem:[#allocation5 + $0x610] sm:$0xff] }
  0xe4   :  { %1387 = vmatprep.subr.mxu0 %v405_v20  ;;  %1492 = vmatprep.subr.mxu1 %v1764_v19  ;;  %v1019_v18 = vld [vmem:[#allocation8 + $0x80] sm:$0xff] }
  0xe5   :  { %1388 = vmatpush3.msra.mxu0 %v357_v21  ;;  %1493 = vmatpush3.msra.mxu1 %v414_v22  ;;  %v1003_v20 = vld [vmem:[#allocation8] sm:$0xff]  ;;  %v1050_v21 = vld [vmem:[#allocation8 + $0x178] sm:$0xff]  ;;  %v1049_v22 = vld [vmem:[#allocation8 + $0x170] sm:$0xff] }
  0xe6   :  { %1389 = vmatprep.subr.mxu0 %v402_v23  ;;  %1494 = vmatprep.subr.mxu1 %v1764_v19  ;;  %v1048_v23 = vld [vmem:[#allocation8 + $0x168] sm:$0xff] }
  0xe7   :  { %1390 = vmatpush3.msra.mxu0 %v354_v24  ;;  %1495 = vmatpush3.msra.mxu1 %v411_v3  ;;  %v1047_v24 = vld [vmem:[#allocation8 + $0x160] sm:$0xff]  ;;  %v1046_v3 = vld [vmem:[#allocation8 + $0x158] sm:$0xff] }
  0xe8   :  { %1391 = vmatprep.subr.mxu0 %v399_v60  ;;  %1496 = vmatprep.mubr.msk.f32.mxu1 %vm1765_vm1, %v1764_v19  ;;  %v1045_v60 = vld [vmem:[#allocation8 + $0x150] sm:$0xff] }
  0xe9   :  { %1392 = vmatpush3.msra.mxu0 %v351_v25  ;;  %1497 = vmatmul.mubr.msk.f32.vlgmr.msra.gmra.mxu1 %vm432_vm0, %v120_v16  ;;  %v1020_v16 = vld [vmem:[#allocation8 + $0x88] sm:$0xff] }
  0xea   :  { %1393 = vmatprep.subr.mxu0 %v396_v5  ;;  %1423 = vmatprep.subr.mxu1 %v1034_v26  ;;  %v1044_v25 = vld [vmem:[#allocation8 + $0x148] sm:$0xff]  ;;  %v1043_v5 = vld [vmem:[#allocation8 + $0x140] sm:$0xff]  ;;  %v1042_v26 = vld [vmem:[#allocation8 + $0x138] sm:$0xff] }
  0xeb   :  { %1394 = vmatpush3.msra.mxu0 %v348_v27  ;;  %1424 = vmatpush3.msra.mxu1 %v1018_v63  ;;  %v1041_v27 = vld [vmem:[#allocation8 + $0x130] sm:$0xff]  ;;  %v1040_v63 = vld [vmem:[#allocation8 + $0x128] sm:$0xff] }
  0xec   :  { %1395 = vmatprep.subr.mxu0 %v393_v28  ;;  %1425 = vmatprep.subr.mxu1 %v1033_v29  ;;  %v1039_v28 = vld [vmem:[#allocation8 + $0x120] sm:$0xff]  ;;  %v1038_v29 = vld [vmem:[#allocation8 + $0x118] sm:$0xff] }
  0xed   :  { %1396 = vmatpush3.msra.mxu0 %v345_v30  ;;  %1426 = vmatpush3.msra.mxu1 %v1017_v31  ;;  %v1037_v30 = vld [vmem:[#allocation8 + $0x110] sm:$0xff]  ;;  %v1036_v31 = vld [vmem:[#allocation8 + $0x108] sm:$0xff] }
  0xee   :  { %1397 = vmatprep.subr.mxu0 %v390_v32  ;;  %1427 = vmatprep.subr.mxu1 %v1032_v33  ;;  %v1035_v32 = vld [vmem:[#allocation8 + $0x100] sm:$0xff]  ;;  %v417_v33 = vlaneseq }
  0xef   :  { %1398 = vmatpush3.msra.mxu0 %v342_v34  ;;  %1428 = vmatpush3.msra.mxu1 %v1016_v35 }
  0xf0   :  { %1399 = vmatprep.subr.mxu0 %v387_v36  ;;  %1429 = vmatprep.subr.mxu1 %v1031_v37  ;;  %v418_v34 = vshrl.u32 %v417_v33, 7  ;;  %v415_v36 = vld [vmem:[#allocation7] sm:$0x7] }
  0xf1   :  { %1400 = vmatpush3.msra.mxu0 %v339_v38  ;;  %1430 = vmatpush3.msra.mxu1 %v1015_v39 }
  0xf2   :  { %1401 = vmatprep.subr.mxu0 %v384_v40  ;;  %1431 = vmatprep.subr.mxu1 %v1030_v41  ;;  %v419_v35 = vsub.s32 0, %v418_v34  ;;  %v423_v37 = vsub.s32 1, %v418_v34 }
  0xf3   :  { %1402 = vmatpush3.msra.mxu0 %v336_v42  ;;  %1432 = vmatpush3.msra.mxu1 %v1014_v43 }
  0xf4   :  { %1403 = vmatprep.subr.mxu0 %v381_v44  ;;  %1433 = vmatprep.subr.mxu1 %v1029_v45  ;;  %v420_v40 = vrot.slane %v415_v36, %v419_v35  ;;  %v424_v41 = vrot.slane %v415_v36, %v423_v37 }
  0xf5   :  { %1404 = vmatpush3.msra.mxu0 %v333_v46  ;;  %1434 = vmatpush3.msra.mxu1 %v1013_v47 }
  0xf6   :  { %1405 = vmatprep.subr.mxu0 %v378_v48  ;;  %1435 = vmatprep.subr.mxu1 %v1028_v49 }
  0xf7   :  { %1406 = vmatpush3.msra.mxu0 %v330_v50  ;;  %1436 = vmatpush3.msra.mxu1 %v1012_v51 }
  0xf8   :  { %1407 = vmatprep.subr.mxu0 %v375_v52  ;;  %1437 = vmatprep.subr.mxu1 %v1027_v53 }
  0xf9   :  { %1408 = vmatpush3.msra.mxu0 %v327_v54  ;;  %1438 = vmatpush3.msra.mxu1 %v1011_v55 }
  0xfa   :  { %1409 = vmatprep.subr.mxu0 %v372_v56  ;;  %1439 = vmatprep.subr.mxu1 %v1026_v57 }
  0xfb   :  { %1410 = vmatpush3.msra.mxu0 %v324_v58  ;;  %1440 = vmatpush3.msra.mxu1 %v1010_v59 }
  0xfc   :  { %1411 = vmatprep.subr.mxu0 %v369_v61  ;;  %1441 = vmatprep.subr.mxu1 %v1025_v62 }
  0xfd   :  { %1412 = vmatpush3.msra.mxu0 %v321_v0  ;;  %1442 = vmatpush3.msra.mxu1 %v1009_v7 }
  0xfe   :  { %1413 = vmatprep.subr.mxu0 %v366_v1  ;;  %1443 = vmatprep.subr.mxu1 %v1024_v9 }
  0xff   :  { %1414 = vmatpush3.msra.mxu0 %v318_v2  ;;  %1444 = vmatpush3.msra.mxu1 %v1008_v10  ;;  %v427_v2 = vsub.s32 2, %v418_v34 }
 0x100   :  { %1415 = vmatprep.subr.mxu0 %v363_v4  ;;  %1445 = vmatprep.subr.mxu1 %v1023_v11 }
 0x101   :  { %1416 = vmatpush3.msra.mxu0 %v315_v6  ;;  %1446 = vmatpush3.msra.mxu1 %v1007_v12  ;;  %v428_v4 = vrot.slane %v415_v36, %v427_v2 }
 0x102   :  { %925 = vmatmul.mubr.f32.vlgmr.msra.gmra.mxu0 %v1842_v8  ;;  %1499 = vmatprep.subr.mxu0 %v1764_v19  ;;  %v1005_v8 = vld [vmem:[#allocation8 + $0x10] sm:$0xff] }
 0x103   :  { %1531 = vmatprep.mubr.msk.f32.mxu0 %vm1765_vm1, %v1764_v19  ;;  %1447 = vmatprep.subr.mxu1 %v1022_v13 }
 0x104   :  { %1448 = vmatpush3.msra.mxu1 %v1006_v14  ;;  %1500 = vmatpush3.msra.mxu0 %v1050_v21  ;;  %v1210_v21 = vld [vmem:[#allocation11 + $0x58] sm:$0xff] }
 0x105   :  { %1449 = vmatprep.subr.mxu1 %v1021_v15  ;;  %1501 = vmatprep.subr.mxu0 %v1764_v19 }
 0x106   :  { %1450 = vmatpush3.msra.mxu1 %v1005_v8  ;;  %1502 = vmatpush3.msra.mxu0 %v1049_v22  ;;  %v1209_v22 = vld [vmem:[#allocation11 + $0x50] sm:$0xff] }
 0x107   :  { %1451 = vmatprep.subr.mxu1 %v1020_v16  ;;  %1503 = vmatprep.subr.mxu0 %v1764_v19  ;;  %v1214_v16 = vld [vmem:[#allocation11 + $0x78] sm:$0xff] }
 0x108   :  { %1452 = vmatpush3.msra.mxu1 %v1004_v17  ;;  %1504 = vmatpush3.msra.mxu0 %v1048_v23  ;;  %v1213_v17 = vld [vmem:[#allocation11 + $0x70] sm:$0xff]  ;;  %v1208_v23 = vld [vmem:[#allocation11 + $0x48] sm:$0xff] }
 0x109   :  { %1453 = vmatprep.subr.mxu1 %v1019_v18  ;;  %1505 = vmatprep.subr.mxu0 %v1764_v19  ;;  %v1212_v18 = vld [vmem:[#allocation11 + $0x68] sm:$0xff] }
 0x10a   :  { %1454 = vmatpush3.msra.mxu1 %v1003_v20  ;;  %1506 = vmatpush3.msra.mxu0 %v1047_v24  ;;  %v1211_v20 = vld [vmem:[#allocation11 + $0x60] sm:$0xff] }
 0x10b   :  { %1534 = vmatprep.subr.mxu1 %v1764_v19  ;;  %1507 = vmatprep.subr.mxu0 %v1764_v19  ;;  %v1207_v24 = vld [vmem:[#allocation11 + $0x40] sm:$0xff] }
 0x10c   :  { %1508 = vmatpush3.msra.mxu0 %v1046_v3  ;;  %v1206_v3 = vld [vmem:[#allocation11 + $0x38] sm:$0xff] }
 0x10d   :  { %1509 = vmatprep.subr.mxu0 %v1764_v19 }
 0x10e   :  { %1510 = vmatpush3.msra.mxu0 %v1045_v60  ;;  %v1205_v60 = vld [vmem:[#allocation11 + $0x30] sm:$0xff] }
 0x10f   :  { %1511 = vmatprep.subr.mxu0 %v1764_v19 }
 0x110   :  { %1512 = vmatpush3.msra.mxu0 %v1044_v25  ;;  %v1204_v25 = vld [vmem:[#allocation11 + $0x28] sm:$0xff] }
 0x111   :  { %1513 = vmatprep.subr.mxu0 %v1764_v19 }
 0x112   :  { %1514 = vmatpush3.msra.mxu0 %v1043_v5  ;;  %v1203_v5 = vld [vmem:[#allocation11 + $0x20] sm:$0xff] }
 0x113   :  { %1515 = vmatprep.subr.mxu0 %v1764_v19 }
 0x114   :  { %1516 = vmatpush3.msra.mxu0 %v1042_v26  ;;  %v1202_v26 = vld [vmem:[#allocation11 + $0x18] sm:$0xff] }
 0x115   :  { %1517 = vmatprep.subr.mxu0 %v1764_v19 }
 0x116   :  { %1518 = vmatpush3.msra.mxu0 %v1041_v27  ;;  %v1201_v27 = vld [vmem:[#allocation11 + $0x10] sm:$0xff] }
 0x117   :  { %1519 = vmatprep.subr.mxu0 %v1764_v19 }
 0x118   :  { %1520 = vmatpush3.msra.mxu0 %v1040_v63  ;;  %v1200_v63 = vld [vmem:[#allocation11 + $0x8] sm:$0xff] }
 0x119   :  { %1521 = vmatprep.subr.mxu0 %v1764_v19 }
 0x11a   :  { %1522 = vmatpush3.msra.mxu0 %v1039_v28  ;;  %v1199_v28 = vld [vmem:[#allocation11] sm:$0xff] }
 0x11b   :  { %1523 = vmatprep.subr.mxu0 %v1764_v19 }
 0x11c   :  { %1524 = vmatpush3.msra.mxu0 %v1038_v29 }
 0x11d   :  { %1525 = vmatprep.subr.mxu0 %v1764_v19 }
 0x11e   :  { %1526 = vmatpush3.msra.mxu0 %v1037_v30 }
 0x11f   :  { %1527 = vmatprep.subr.mxu0 %v1764_v19 }
 0x120   :  { %1528 = vmatpush3.msra.mxu0 %v1036_v31 }
 0x121   :  { %1529 = vmatprep.subr.mxu0 %v1764_v19 }
 0x122   :  { %1530 = vmatpush3.msra.mxu0 %v1035_v32  ;;  %v1313_v32 = vld [vmem:[#allocation10] ss:$0 sm:$0xff] }
 0x15a   :  { %v502_v39 = vpop.f32.mrf.mxu0 }
 0x15b   :  { %v503_v45 = vadd.f32 %v502_v39, %v420_v40 }
 0x15c   :  { %v504_v43 = vpop.f32.mrf.mxu0 }
 0x15d   :  { %v573_v38 = vpop.f32.mrf.mxu1  ;;  %v505_v47 = vadd.f32 %v504_v43, %v424_v41 }
 0x15e   :  { %v574_v50 = vadd.f32 %v573_v38, %v503_v45  ;;  %v1314_v38 = vld [vmem:[#allocation13] ss:$0 sm:$0xff] }
 0x15f   :  { %v575_v42 = vpop.f32.mrf.mxu1 }
 0x160   :  { %v576_v51 = vadd.f32 %v575_v42, %v505_v47 }
 0x180   :  { %v1347_v44 = vpop.f32.mrf.mxu1 }
 0x182   :  { %v1348_v49 = vpop.f32.mrf.mxu1 }
 0x183   :  { %v1349_v6 = vadd.f32 %v1348_v49, %v1347_v44 }
 0x185   :  { %v787_v7 = vadd.f32 %v1349_v6, %v428_v4 }
 0x19c   :  { %v644_v46 = vpop.f32.mrf.mxu0 }
 0x19d   :  { %v645_v52 = vadd.f32 %v644_v46, %v574_v50 }
 0x19e   :  { %v646_v48 = vpop.f32.mrf.mxu0 }
 0x19f   :  { %v647_v54 = vadd.f32 %v646_v48, %v576_v51 }
 0x1a1   :  { %v1382_v55 = vpop.f32.mrf.mxu1 }
 0x1a2   :  { %v715_v53 = vpop.f32.mrf.mxu0 }
 0x1a3   :  { %v716_v56 = vadd.f32 %v715_v53, %v645_v52  ;;  %v1383_v59 = vpop.f32.mrf.mxu1 }
 0x1a4   :  { %v717_v57 = vpop.f32.mrf.mxu0  ;;  %v1384_v9 = vadd.f32 %v1383_v59, %v1382_v55 }
 0x1a5   :  { %v718_v58 = vadd.f32 %v717_v57, %v647_v54  ;;  %v1000_v62 = vmax.f32 %v716_v56, 0.0 }
 0x1a6   :  { %v857_v12 = vadd.f32 %v1384_v9, %v787_v7 }
 0x1a7   :  { %v1001_v61 = vmax.f32 %v718_v58, 0.0 }
 0x1a9   :  { %1122 = vmatprep.mubr.f32.mxu1 %v1001_v61  ;;  %v996_v0 = vpop.f32.mrf.mxu1 }
 0x1aa   :  { %1123 = vmatmul.mubr.f32.vlgmr.msra.gmra.mxu1 %v1000_v62 }
 0x1ab   :  { %v1498_v1 = vpop.f32.mrf.mxu1  ;;  %1566 = vmatprep.mubr.msk.f32.mxu1 %vm1765_vm1, %v1764_v19  ;;  %1535 = vmatpush3.msra.mxu1 %v1214_v16 }
 0x1ac   :  { %1536 = vmatprep.subr.mxu1 %v1764_v19 }
 0x1ad   :  { %1537 = vmatpush3.msra.mxu1 %v1213_v17 }
 0x1ae   :  { %1538 = vmatprep.subr.mxu1 %v1764_v19 }
 0x1af   :  { %1539 = vmatpush3.msra.mxu1 %v1212_v18 }
 0x1b0   :  { %1540 = vmatprep.subr.mxu1 %v1764_v19 }
 0x1b1   :  { %1541 = vmatpush3.msra.mxu1 %v1211_v20 }
 0x1b2   :  { %1542 = vmatprep.subr.mxu1 %v1764_v19 }
 0x1b3   :  { %1543 = vmatpush3.msra.mxu1 %v1210_v21 }
 0x1b4   :  { %1544 = vmatprep.subr.mxu1 %v1764_v19 }
 0x1b5   :  { %1545 = vmatpush3.msra.mxu1 %v1209_v22 }
 0x1b6   :  { %1546 = vmatprep.subr.mxu1 %v1764_v19 }
 0x1b7   :  { %1547 = vmatpush3.msra.mxu1 %v1208_v23 }
 0x1b8   :  { %1548 = vmatprep.subr.mxu1 %v1764_v19 }
 0x1b9   :  { %1549 = vmatpush3.msra.mxu1 %v1207_v24 }
 0x1ba   :  { %1550 = vmatprep.subr.mxu1 %v1764_v19 }
 0x1bb   :  { %1551 = vmatpush3.msra.mxu1 %v1206_v3 }
 0x1bc   :  { %1552 = vmatprep.subr.mxu1 %v1764_v19 }
 0x1bd   :  { %1553 = vmatpush3.msra.mxu1 %v1205_v60 }
 0x1be   :  { %1554 = vmatprep.subr.mxu1 %v1764_v19 }
 0x1bf   :  { %1555 = vmatpush3.msra.mxu1 %v1204_v25 }
 0x1c0   :  { %1556 = vmatprep.subr.mxu1 %v1764_v19 }
 0x1c1   :  { %1557 = vmatpush3.msra.mxu1 %v1203_v5 }
 0x1c2   :  { %v1417_v10 = vpop.f32.mrf.mxu0  ;;  %1558 = vmatprep.subr.mxu1 %v1764_v19 }
 0x1c3   :  { %1559 = vmatpush3.msra.mxu1 %v1202_v26 }
 0x1c4   :  { %v1418_v11 = vpop.f32.mrf.mxu0  ;;  %1560 = vmatprep.subr.mxu1 %v1764_v19 }
 0x1c5   :  { %v1419_v13 = vadd.f32 %v1418_v11, %v1417_v10  ;;  %1561 = vmatpush3.msra.mxu1 %v1201_v27 }
 0x1c6   :  { %1562 = vmatprep.subr.mxu1 %v1764_v19 }
 0x1c7   :  { %v927_v14 = vadd.f32 %v1419_v13, %v857_v12  ;;  %1563 = vmatpush3.msra.mxu1 %v1200_v63 }
 0x1c8   :  { %1564 = vmatprep.subr.mxu1 %v1764_v19 }
 0x1c9   :  { %v997_v15 = vadd.f32 %v996_v0, %v927_v14  ;;  %1565 = vmatpush3.msra.mxu1 %v1199_v28 }
 0x1cb   :  { %v1002_v8 = vmax.f32 %v997_v15, 0.0 }
 0x1cd   :  { %1532 = vmatmul.mubr.f32.vlgmr.msra.gmra.mxu0 %v1002_v8 }
 0x26a   :  { %v1455_v29 = vpop.f32.mrf.mxu1 }
 0x26c   :  { %v1456_v30 = vpop.f32.mrf.mxu1 }
 0x26d   :  { %v1457_v31 = vadd.f32 %v1456_v30, %v1455_v29 }
 0x26f   :  { %v1125_v33 = vadd.f32 %v1457_v31, %v1313_v32 }
 0x28d   :  { %v1194_v34 = vpop.f32.mrf.mxu0 }
 0x28e   :  { %v1195_v35 = vadd.f32 %v1194_v34, %v1125_v33 }
 0x28f   :  { %v1533_v36 = vpop.f32.mrf.mxu0 }
 0x290   :  { %v1198_v37 = vmax.f32 %v1195_v35, 0.0 }
 0x292   :  { %1567 = vmatmul.mubr.f32.vlgmr.msra.gmra.mxu1 %v1198_v37 }
 0x352   :  { %v1288_v39 = vpop.f32.mrf.mxu1 }
 0x353   :  { %v1289_v40 = vadd.f32 %v1314_v38, %v1288_v39 }
 0x354   :  { %v1568_v41 = vpop.f32.mrf.mxu1 }
 0x355   :  { %1292 = vst [vmem:[#allocation14] sm:$0xff] %v1289_v40 }
 0x356   :  { %1734 = shalt.err (!%p1731_p11)
}
 0x357   :  { %1302 = dma.vmem_to_hbm [thread:$0]  %s1300_s6, 128, %s1901_s7, [#allocation4]  }
 0x358   :  { %1751 = dma.done.wait [#allocation4], 128  }
 0x359   :  { %1752 = vsyncadd [#allocation4], 4294967168 }
 0x35a   :  { %1306 = vsyncpa [#allocation3], 1 }
 0x35b   :  { %1307 = vsyncpa [#allocation6], 1 }
 0x35c   :  { %1308 = vsyncpa [#allocation9], 1 }
 0x35d   :  { %1309 = vsyncpa [#allocation12], 1 }
 0x35e   :  { %1310 = vsyncpa [#allocation4], 1 }

</bundles_post_ra>
